<compile_context>
chip_gen: v7x
topology: tpu7x:2x2x1
jax: 0.10.0
libtpu: 0.0.40
codegen_flags: <defaults>
</compile_context>

<pallas_src>
import jax
import jax.numpy as jnp
from jax import lax
from jax.experimental import pallas as pl
from jax.experimental.pallas import tpu as pltpu


def _round_up(x, m):
    return (x + m - 1) // m * m


_SMALL_M = 64                       # GEMMs with fewer rows -> plain jnp.dot
_VMEM_LIMIT = 32 * 1024 * 1024      # fits v5e/v6e/v7x scoped-VMEM budgets


# ----------------- Pallas kernel: conv GEMM with fused BN stats --------------

def _matmul_stats_kernel(a_ref, b_ref, o_ref, s_ref, q_ref):
    acc = jnp.dot(a_ref[...], b_ref[...], preferred_element_type=jnp.float32)
    o_ref[...] = acc.astype(o_ref.dtype)
    # Per-tile column sum / sum-of-squares for the following BatchNorm, so the
    # conv output is never re-read from HBM just to compute batch statistics.
    # (Broadcast over 8 sublanes keeps the side-output block layout-legal.)
    s_ref[...] = jnp.broadcast_to(jnp.sum(acc, axis=0, keepdims=True),
                                  s_ref.shape)
    q_ref[...] = jnp.broadcast_to(jnp.sum(acc * acc, axis=0, keepdims=True),
                                  q_ref.shape)


def pallas_conv_matmul(a, b, out_dtype=jnp.bfloat16):
    """C = A @ B on the MXU (bf16 operands, f32 accumulation) plus fused
    per-column sum / sum-of-squares of C (for training-mode BatchNorm).

    K and N are single full-depth blocks (no padding of the patch matrix apart
    from rounding K to a multiple of 16 for bf16 packing); M is tiled so there
    are always >= 2 "parallel" grid blocks, feeding both v7x TensorCores."""
    M, K = a.shape
    K2, N = b.shape
    assert K == K2
    if a.dtype != jnp.bfloat16:
        a = a.astype(jnp.bfloat16)
    if b.dtype != jnp.bfloat16:
        b = b.astype(jnp.bfloat16)

    Kp = _round_up(K, 16)
    if Kp != K:                       # only the 7x7 stem (K=147) pads; zeros
        a = jnp.pad(a, ((0, 0), (0, Kp - K)))   # change neither C nor stats
        b = jnp.pad(b, ((0, Kp - K), (0, 0)))

    tm = min(256, _round_up(max((M + 1) // 2, 8), 8))
    Mp = _round_up(M, tm)
    gm = Mp // tm
    if Mp != M:                       # zero rows: no effect on column stats
        a = jnp.pad(a, ((0, Mp - M), (0, 0)))

    out, sums, sqs = pl.pallas_call(
        _matmul_stats_kernel,
        out_shape=(jax.ShapeDtypeStruct((Mp, N), out_dtype),
                   jax.ShapeDtypeStruct((gm * 8, N), jnp.float32),
                   jax.ShapeDtypeStruct((gm * 8, N), jnp.float32)),
        grid_spec=pltpu.PrefetchScalarGridSpec(
            num_scalar_prefetch=0,
            grid=(gm,),
            in_specs=[pl.BlockSpec((tm, Kp), lambda i: (i, 0)),
                      pl.BlockSpec((Kp, N), lambda i: (0, 0))],
            out_specs=(pl.BlockSpec((tm, N), lambda i: (i, 0)),
                       pl.BlockSpec((8, N), lambda i: (i, 0)),
                       pl.BlockSpec((8, N), lambda i: (i, 0)))),
        compiler_params=pltpu.CompilerParams(
            dimension_semantics=("parallel",),
            vmem_limit_bytes=_VMEM_LIMIT),
    )(a, b)

    if Mp != M:
        out = out[:M]
    col_sum = jnp.sum(sums, axis=0) * 0.125   # each tile sum is repeated x8
    col_sq = jnp.sum(sqs, axis=0) * 0.125
    return out, col_sum, col_sq


# --------- Pallas kernel: fused bn3-apply + CBAM gate + residual + ReLU ------

def _cbam_merge_kernel(r_ref, x_ref, sa_ref, ca_ref, s_ref, t_ref, o_ref):
    y = r_ref[...].astype(jnp.float32) * s_ref[...] + t_ref[...]   # bn3 apply
    gate = ca_ref[...] * sa_ref[...]                               # CBAM gate
    o_ref[...] = jnp.maximum(y * gate + x_ref[...].astype(jnp.float32),
                             0.0).astype(o_ref.dtype)


def pallas_cbam_merge(r3, x_in, sa, ca, s3, t3):
    """out = relu((r3*s3 + t3) * ca * sa + x_in) for identity-shortcut blocks.

    Gridded over batch so `ca` (per-sample, per-channel) and `sa` (per-sample,
    per-pixel) stay rank-reduced; emits bf16 (feeds the next conv's im2col
    directly, avoiding a separate XLA convert pass)."""
    N, H, W, C = r3.shape
    HW = H * W
    out = pl.pallas_call(
        _cbam_merge_kernel,
        out_shape=jax.ShapeDtypeStruct((N, HW, C), jnp.bfloat16),
        grid_spec=pltpu.PrefetchScalarGridSpec(
            num_scalar_prefetch=0,
            grid=(N,),
            in_specs=[pl.BlockSpec((1, HW, C), lambda n: (n, 0, 0)),
                      pl.BlockSpec((1, HW, C), lambda n: (n, 0, 0)),
                      pl.BlockSpec((1, HW, 1), lambda n: (n, 0, 0)),
                      pl.BlockSpec((1, 1, C), lambda n: (n, 0, 0)),
                      pl.BlockSpec((1, 1, C), lambda n: (0, 0, 0)),
                      pl.BlockSpec((1, 1, C), lambda n: (0, 0, 0))],
            out_specs=pl.BlockSpec((1, HW, C), lambda n: (n, 0, 0))),
        compiler_params=pltpu.CompilerParams(
            dimension_semantics=("parallel",),
            vmem_limit_bytes=_VMEM_LIMIT),
    )(r3.reshape(N, HW, C),
      x_in.reshape(N, HW, C),
      sa.reshape(N, HW, 1).astype(jnp.float32),
      ca.reshape(N, 1, C).astype(jnp.float32),
      s3.reshape(1, 1, C).astype(jnp.float32),
      t3.reshape(1, 1, C).astype(jnp.float32))
    return out.reshape(N, H, W, C)


# ------------------------------- NN building blocks --------------------------

def _im2col(x_nhwc, kh, kw, stride, pad):
    # TODO(synk): an implicit-GEMM kernel (gathering the (kh,kw) taps via the
    # matmul index_map) would avoid materializing this patch tensor.
    N, H, W, C = x_nhwc.shape
    xp = jnp.pad(x_nhwc, ((0, 0), (pad, pad), (pad, pad), (0, 0)))
    Ho = (H + 2 * pad - kh) // stride + 1
    Wo = (W + 2 * pad - kw) // stride + 1
    cols = []
    for i in range(kh):
        for j in range(kw):
            cols.append(xp[:, i:i + stride * (Ho - 1) + 1:stride,
                           j:j + stride * (Wo - 1) + 1:stride, :])
    patches = jnp.stack(cols, axis=3)            # (N, Ho, Wo, kh*kw, C)
    return patches.reshape(N * Ho * Wo, kh * kw * C), Ho, Wo


def _conv_cols(x_nhwc, w_oihw, stride, pad):
    Cout, Cin, kh, kw = w_oihw.shape
    N = x_nhwc.shape[0]
    if kh == 1 and kw == 1 and pad == 0:
        xs = x_nhwc[:, ::stride, ::stride, :]
        _, Ho, Wo, _ = xs.shape
        return (xs.reshape(N * Ho * Wo, Cin),
                jnp.transpose(w_oihw[:, :, 0, 0]), Ho, Wo)
    cols, Ho, Wo = _im2col(x_nhwc, kh, kw, stride, pad)
    w_mat = jnp.transpose(w_oihw, (2, 3, 1, 0)).reshape(kh * kw * Cin, Cout)
    return cols, w_mat, Ho, Wo


def conv_raw(x_nhwc, w_oihw, stride, pad, w_scale=None, out_dtype=jnp.bfloat16):
    """Bias-free PyTorch-style conv (OIHW weights).  Returns the raw (pre-BN)
    output plus per-channel batch mean / variance (training-mode BN stats)."""
    cols, w_mat, Ho, Wo = _conv_cols(x_nhwc, w_oihw, stride, pad)
    if w_scale is not None:                  # fold a per-input-channel scale
        w_mat = w_mat * w_scale[:, None]
    M = cols.shape[0]
    Cout = w_mat.shape[1]
    if M >= _SMALL_M:
        out2d, col_sum, col_sq = pallas_conv_matmul(cols, w_mat, out_dtype)
        mean = col_sum / M
        var = jnp.maximum(col_sq / M - mean * mean, 0.0)
    else:
        # Degenerate-M GEMM (layers 2-4 at this input size): the MXU would be
        # <1% utilized, so let XLA handle it; two-pass variance because deep
        # layers normalize over only a handful of samples per channel.
        r = jnp.dot(cols.astype(jnp.float32), w_mat.astype(jnp.float32),
                    preferred_element_type=jnp.float32)
        mean = jnp.mean(r, axis=0)
        var = jnp.mean(jnp.square(r - mean), axis=0)
        out2d = r.astype(out_dtype)
    N = x_nhwc.shape[0]
    return out2d.reshape(N, Ho, Wo, Cout), mean, var


def bn_affine(mean, var, gamma, beta, eps=1e-5):
    """Training-mode BatchNorm folded to a per-channel scale / shift."""
    scale = gamma * lax.rsqrt(var + eps)
    return scale, beta - mean * scale


def channel_attention(y, p):
    # Degenerate GEMMs (rows = batch, hidden = C/16): plain JAX per perf review.
    avg = jnp.mean(y, axis=(1, 2))
    mx = jnp.max(y, axis=(1, 2))

    def mlp(v):
        h = jnp.maximum(v @ p['w1'] + p['b1'], 0.0)
        return h @ p['w2'] + p['b2']

    return jax.nn.sigmoid(mlp(avg) + mlp(mx))          # (N, C)


def spatial_attention(cat_nhw2, w_oihw, b):
    # 7x7 conv with Cin=2, Cout=1 is far too degenerate for the MXU kernel.
    y = lax.conv_general_dilated(cat_nhw2, w_oihw, window_strides=(1, 1),
                                 padding=((3, 3), (3, 3)),
                                 dimension_numbers=('NHWC', 'OIHW', 'NHWC'))
    return jax.nn.sigmoid(y + b)                       # (N, H, W, 1)


def residual_block(x, p, stride):
    # conv1 -> bn1 -> relu.  BN stats come fused from the matmul; the apply is
    # plain jnp so XLA fuses it into conv2's im2col gather (bf16 out).
    r1, m1, v1 = conv_raw(x, p['conv1_w'], stride, 1)
    s1, t1 = bn_affine(m1, v1, p['bn1_g'], p['bn1_b'])
    y1 = jnp.maximum(r1.astype(jnp.float32) * s1 + t1, 0.0).astype(jnp.bfloat16)

    # conv2 -> bn2 -> conv3 -> bn3.  The reference block has no nonlinearity
    # between bn2 and conv3, so bn2's scale folds into conv3's 1x1 weights and
    # its shift (per-channel constant) cancels inside bn3's normalization.
    r2, m2, v2 = conv_raw(y1, p['conv2_w'], 1, 1)
    s2, _ = bn_affine(m2, v2, p['bn2_g'], p['bn2_b'])
    r3, m3, v3 = conv_raw(r2, p['conv3_w'], 1, 0, w_scale=s2)
    s3, t3 = bn_affine(m3, v3, p['bn3_g'], p['bn3_b'])
    y3 = r3.astype(jnp.float32) * s3 + t3              # bn3 output (jnp expr)

    N, H, W, C = y3.shape

    # CBAM: channel attention from y3; spatial attention from t = ca*y3 (the
    # multiply fuses into the channel reductions, never materialized alone).
    ca = channel_attention(y3, p['cbam']['ca'])        # (N, C)
    t = y3 * ca[:, None, None, :]
    cat = jnp.concatenate([jnp.mean(t, axis=3, keepdims=True),
                           jnp.max(t, axis=3, keepdims=True)], axis=3)
    sa = spatial_attention(cat, p['cbam']['sa_w'], p['cbam']['sa_b'])

    if 'sc_w' in p:
        # Downsample shortcut: these blocks sit on the small-M jnp path, so the
        # whole merge stays in one XLA fusion.
        rsc, msc, vsc = conv_raw(x, p['sc_w'], stride, 0, out_dtype=jnp.float32)
        ssc, tsc = bn_affine(msc, vsc, p['sc_g'], p['sc_b'])
        out = jnp.maximum(t * sa + (rsc * ssc + tsc), 0.0)
        return out.astype(jnp.bfloat16)
    if H * W >= 64:
        # Identity shortcut, big enough tile: fused Pallas merge
        # (bn3 apply + CBAM gating + residual add + ReLU, bf16 out).
        return pallas_cbam_merge(r3, x, sa, ca, s3, t3)
    out = jnp.maximum(t * sa + x.astype(jnp.float32), 0.0)
    return out.astype(jnp.bfloat16)


_BLOCK_STRIDES = (1, 1, 2, 1, 2, 1, 2, 1)   # layer1..layer4, 2 blocks each


def resnet18_cbam_forward(x_nchw, params):
    # NCHW -> NHWC; activations travel in bf16 between kernels, f32 statistics.
    x = jnp.transpose(x_nchw, (0, 2, 3, 1)).astype(jnp.bfloat16)
    r, m, v = conv_raw(x, params['conv1_w'], 2, 3)
    s, t = bn_affine(m, v, params['bn1_g'], params['bn1_b'])
    x = jnp.maximum(r.astype(jnp.float32) * s + t, 0.0)
    # 3x3 / stride-2 / pad-1 max-pool (pads with -inf, matching PyTorch).
    x = lax.reduce_window(x, -jnp.inf, lax.max,
                          window_dimensions=(1, 3, 3, 1),
                          window_strides=(1, 2, 2, 1),
                          padding=((0, 0), (1, 1), (1, 1), (0, 0)))
    x = x.astype(jnp.bfloat16)
    for blk, stride in zip(params['blocks'], _BLOCK_STRIDES):
        x = residual_block(x, blk, stride)
    feat = jnp.mean(x.astype(jnp.float32), axis=(1, 2))   # avg-pool + flatten
    # Final (2, 512) x (512, 10) GEMM is degenerate for the MXU -> plain JAX.
    return feat @ params['fc_w'] + params['fc_b']


# ------------------------------ parameter init -------------------------------

def init_params(key, num_classes=10, reduction=16):
    keys = iter(jax.random.split(key, 512))

    def nrm(shape, scale=0.05):
        return (scale * jax.random.normal(next(keys), shape)).astype(jnp.float32)

    def cbam_params(C):
        hid = C // reduction
        return dict(ca=dict(w1=nrm((C, hid)), b1=nrm((hid,)),
                            w2=nrm((hid, C)), b2=nrm((C,))),
                    sa_w=nrm((1, 2, 7, 7)), sa_b=nrm((1,)))

    def block_params(cin, cout, stride):
        p = dict(conv1_w=nrm((cout, cin, 3, 3)),
                 bn1_g=jnp.ones((cout,), jnp.float32),
                 bn1_b=jnp.zeros((cout,), jnp.float32),
                 conv2_w=nrm((cout, cout, 3, 3)),
                 bn2_g=jnp.ones((cout,), jnp.float32),
                 bn2_b=jnp.zeros((cout,), jnp.float32),
                 conv3_w=nrm((cout, cout, 1, 1)),
                 bn3_g=jnp.ones((cout,), jnp.float32),
                 bn3_b=jnp.zeros((cout,), jnp.float32),
                 cbam=cbam_params(cout))
        if stride != 1 or cin != cout:
            p['sc_w'] = nrm((cout, cin, 1, 1))
            p['sc_g'] = jnp.ones((cout,), jnp.float32)
            p['sc_b'] = jnp.zeros((cout,), jnp.float32)
        return p

    blocks = []
    cin = 64
    for cout, num, stride in [(64, 2, 1), (128, 2, 2), (256, 2, 2), (512, 2, 2)]:
        blocks.append(block_params(cin, cout, stride))
        cin = cout
        for _ in range(1, num):
            blocks.append(block_params(cin, cout, 1))

    return dict(conv1_w=nrm((64, 3, 7, 7)),
                bn1_g=jnp.ones((64,), jnp.float32),
                bn1_b=jnp.zeros((64,), jnp.float32),
                blocks=blocks,
                fc_w=nrm((512, num_classes)),
                fc_b=nrm((num_classes,)))


# ----------------------------------- main ------------------------------------

if __name__ == "__main__":
    key = jax.random.PRNGKey(0)
    k_params, k_input = jax.random.split(key)
    params = init_params(k_params, num_classes=10)
    # Small input consistent with the module: NCHW, 3 input channels.
    x = jax.random.normal(k_input, (2, 3, 32, 32), dtype=jnp.float32)

    fwd = jax.jit(resnet18_cbam_forward)
    logits = jax.block_until_ready(fwd(x, params))

    assert logits.shape == (2, 10)
    assert bool(jnp.all(jnp.isfinite(logits)))
    print("KERNEL_OK")
</pallas_src>

<mosaic_0001>
module attributes {stable_mosaic.version = 11 : i64} {
  func.func @_matmul_stats_kernel(%arg0: i32, %arg1: memref<256x160xbf16, #tpu.memory_space<vmem>>, %arg2: memref<160x64xbf16, #tpu.memory_space<vmem>>, %arg3: memref<256x64xbf16, #tpu.memory_space<vmem>>, %arg4: memref<8x64xf32, #tpu.memory_space<vmem>>, %arg5: memref<8x64xf32, #tpu.memory_space<vmem>>) attributes {dimension_semantics = [#tpu.dimension_semantics<parallel>], iteration_bounds = array<i64: 2>, scalar_prefetch = 0 : i64, scratch_operands = 0 : i64, tpu.core_type = #tpu.core_type<tc>, window_params = [{transform_indices = @transform_0, window_bounds = array<i64: 256, 160>}, {pipeline_mode = #tpu.pipeline_mode<synchronous>, transform_indices = @transform_1, window_bounds = array<i64: 160, 64>}, {transform_indices = @transform_2, window_bounds = array<i64: 256, 64>}, {transform_indices = @transform_3, window_bounds = array<i64: 8, 64>}, {transform_indices = @transform_4, window_bounds = array<i64: 8, 64>}]} {
    %c0 = arith.constant 0 : index
    %c0_0 = arith.constant 0 : index
    %0 = vector.load %arg1[%c0, %c0_0] : memref<256x160xbf16, #tpu.memory_space<vmem>>, vector<256x160xbf16>
    %c0_1 = arith.constant 0 : index
    %c0_2 = arith.constant 0 : index
    %1 = vector.load %arg2[%c0_1, %c0_2] : memref<160x64xbf16, #tpu.memory_space<vmem>>, vector<160x64xbf16>
    %cst = arith.constant dense<0.000000e+00> : vector<256x64xf32>
    %2 = tpu.matmul %0, %1, %cst {dimension_numbers = #tpu.dot_dimension_numbers<[1], [0], [0], [1], [0, 0, 1, 1], [], []>} : vector<256x160xbf16>, vector<160x64xbf16>, vector<256x64xf32> -> vector<256x64xf32>
    %3 = arith.truncf %2 : vector<256x64xf32> to vector<256x64xbf16>
    %c0_3 = arith.constant 0 : index
    %c0_4 = arith.constant 0 : index
    %4 = vector.load %arg3[%c0_3, %c0_4] : memref<256x64xbf16, #tpu.memory_space<vmem>>, vector<256x64xbf16>
    tpu.vector_store %arg3[%c0_3, %c0_4], %3 {strides = array<i32>} : memref<256x64xbf16, #tpu.memory_space<vmem>>, vector<256x64xbf16>,
    %cst_5 = arith.constant dense<0.000000e+00> : vector<64xf32>
    %5 = vector.multi_reduction <add>, %2, %cst_5 [0] : vector<256x64xf32> to vector<64xf32>
    %6 = vector.shape_cast %5 : vector<64xf32> to vector<1x64xf32>
    %7 = vector.shape_cast %6 : vector<1x64xf32> to vector<1x64xf32>
    %8 = vector.broadcast %7 : vector<1x64xf32> to vector<8x64xf32>
    %c0_6 = arith.constant 0 : index
    %c0_7 = arith.constant 0 : index
    %9 = vector.load %arg4[%c0_6, %c0_7] : memref<8x64xf32, #tpu.memory_space<vmem>>, vector<8x64xf32>
    tpu.vector_store %arg4[%c0_6, %c0_7], %8 {strides = array<i32>} : memref<8x64xf32, #tpu.memory_space<vmem>>, vector<8x64xf32>,
    %10 = arith.mulf %2, %2 : vector<256x64xf32>
    %cst_8 = arith.constant dense<0.000000e+00> : vector<64xf32>
    %11 = vector.multi_reduction <add>, %10, %cst_8 [0] : vector<256x64xf32> to vector<64xf32>
    %12 = vector.shape_cast %11 : vector<64xf32> to vector<1x64xf32>
    %13 = vector.shape_cast %12 : vector<1x64xf32> to vector<1x64xf32>
    %14 = vector.broadcast %13 : vector<1x64xf32> to vector<8x64xf32>
    %c0_9 = arith.constant 0 : index
    %c0_10 = arith.constant 0 : index
    %15 = vector.load %arg5[%c0_9, %c0_10] : memref<8x64xf32, #tpu.memory_space<vmem>>, vector<8x64xf32>
    tpu.vector_store %arg5[%c0_9, %c0_10], %14 {strides = array<i32>} : memref<8x64xf32, #tpu.memory_space<vmem>>, vector<8x64xf32>,
    return
  }
  func.func @transform_0(%arg0: i32) -> (i32, i32) {
    %c0_i32 = arith.constant 0 : i32
    %c0_i32_0 = arith.constant 0 : i32
    return %arg0, %c0_i32 : i32, i32
  }
  func.func @transform_1(%arg0: i32) -> (i32, i32) {
    %c0_i32 = arith.constant 0 : i32
    %c0_i32_0 = arith.constant 0 : i32
    %c0_i32_1 = arith.constant 0 : i32
    return %c0_i32, %c0_i32_0 : i32, i32
  }
  func.func @transform_2(%arg0: i32) -> (i32, i32) {
    %c0_i32 = arith.constant 0 : i32
    %c0_i32_0 = arith.constant 0 : i32
    return %arg0, %c0_i32 : i32, i32
  }
  func.func @transform_3(%arg0: i32) -> (i32, i32) {
    %c0_i32 = arith.constant 0 : i32
    %c0_i32_0 = arith.constant 0 : i32
    return %arg0, %c0_i32 : i32, i32
  }
  func.func @transform_4(%arg0: i32) -> (i32, i32) {
    %c0_i32 = arith.constant 0 : i32
    %c0_i32_0 = arith.constant 0 : i32
    return %arg0, %c0_i32 : i32, i32
  }
}

module attributes {stable_mosaic.version = 11 : i64} {
  func.func @_matmul_stats_kernel(%arg0: i32, %arg1: memref<64x576xbf16, #tpu.memory_space<vmem>>, %arg2: memref<576x64xbf16, #tpu.memory_space<vmem>>, %arg3: memref<64x64xbf16, #tpu.memory_space<vmem>>, %arg4: memref<8x64xf32, #tpu.memory_space<vmem>>, %arg5: memref<8x64xf32, #tpu.memory_space<vmem>>) attributes {dimension_semantics = [#tpu.dimension_semantics<parallel>], iteration_bounds = array<i64: 2>, scalar_prefetch = 0 : i64, scratch_operands = 0 : i64, tpu.core_type = #tpu.core_type<tc>, window_params = [{transform_indices = @transform_0, window_bounds = array<i64: 64, 576>}, {pipeline_mode = #tpu.pipeline_mode<synchronous>, transform_indices = @transform_1, window_bounds = array<i64: 576, 64>}, {transform_indices = @transform_2, window_bounds = array<i64: 64, 64>}, {transform_indices = @transform_3, window_bounds = array<i64: 8, 64>}, {transform_indices = @transform_4, window_bounds = array<i64: 8, 64>}]} {
    %c0 = arith.constant 0 : index
    %c0_0 = arith.constant 0 : index
    %0 = vector.load %arg1[%c0, %c0_0] : memref<64x576xbf16, #tpu.memory_space<vmem>>, vector<64x576xbf16>
    %c0_1 = arith.constant 0 : index
    %c0_2 = arith.constant 0 : index
    %1 = vector.load %arg2[%c0_1, %c0_2] : memref<576x64xbf16, #tpu.memory_space<vmem>>, vector<576x64xbf16>
    %cst = arith.constant dense<0.000000e+00> : vector<64x64xf32>
    %2 = tpu.matmul %0, %1, %cst {dimension_numbers = #tpu.dot_dimension_numbers<[1], [0], [0], [1], [0, 0, 1, 1], [], []>} : vector<64x576xbf16>, vector<576x64xbf16>, vector<64x64xf32> -> vector<64x64xf32>
    %3 = arith.truncf %2 : vector<64x64xf32> to vector<64x64xbf16>
    %c0_3 = arith.constant 0 : index
    %c0_4 = arith.constant 0 : index
    %4 = vector.load %arg3[%c0_3, %c0_4] : memref<64x64xbf16, #tpu.memory_space<vmem>>, vector<64x64xbf16>
    tpu.vector_store %arg3[%c0_3, %c0_4], %3 {strides = array<i32>} : memref<64x64xbf16, #tpu.memory_space<vmem>>, vector<64x64xbf16>,
    %cst_5 = arith.constant dense<0.000000e+00> : vector<64xf32>
    %5 = vector.multi_reduction <add>, %2, %cst_5 [0] : vector<64x64xf32> to vector<64xf32>
    %6 = vector.shape_cast %5 : vector<64xf32> to vector<1x64xf32>
    %7 = vector.shape_cast %6 : vector<1x64xf32> to vector<1x64xf32>
    %8 = vector.broadcast %7 : vector<1x64xf32> to vector<8x64xf32>
    %c0_6 = arith.constant 0 : index
    %c0_7 = arith.constant 0 : index
    %9 = vector.load %arg4[%c0_6, %c0_7] : memref<8x64xf32, #tpu.memory_space<vmem>>, vector<8x64xf32>
    tpu.vector_store %arg4[%c0_6, %c0_7], %8 {strides = array<i32>} : memref<8x64xf32, #tpu.memory_space<vmem>>, vector<8x64xf32>,
    %10 = arith.mulf %2, %2 : vector<64x64xf32>
    %cst_8 = arith.constant dense<0.000000e+00> : vector<64xf32>
    %11 = vector.multi_reduction <add>, %10, %cst_8 [0] : vector<64x64xf32> to vector<64xf32>
    %12 = vector.shape_cast %11 : vector<64xf32> to vector<1x64xf32>
    %13 = vector.shape_cast %12 : vector<1x64xf32> to vector<1x64xf32>
    %14 = vector.broadcast %13 : vector<1x64xf32> to vector<8x64xf32>
    %c0_9 = arith.constant 0 : index
    %c0_10 = arith.constant 0 : index
    %15 = vector.load %arg5[%c0_9, %c0_10] : memref<8x64xf32, #tpu.memory_space<vmem>>, vector<8x64xf32>
    tpu.vector_store %arg5[%c0_9, %c0_10], %14 {strides = array<i32>} : memref<8x64xf32, #tpu.memory_space<vmem>>, vector<8x64xf32>,
    return
  }
  func.func @transform_0(%arg0: i32) -> (i32, i32) {
    %c0_i32 = arith.constant 0 : i32
    %c0_i32_0 = arith.constant 0 : i32
    return %arg0, %c0_i32 : i32, i32
  }
  func.func @transform_1(%arg0: i32) -> (i32, i32) {
    %c0_i32 = arith.constant 0 : i32
    %c0_i32_0 = arith.constant 0 : i32
    %c0_i32_1 = arith.constant 0 : i32
    return %c0_i32, %c0_i32_0 : i32, i32
  }
  func.func @transform_2(%arg0: i32) -> (i32, i32) {
    %c0_i32 = arith.constant 0 : i32
    %c0_i32_0 = arith.constant 0 : i32
    return %arg0, %c0_i32 : i32, i32
  }
  func.func @transform_3(%arg0: i32) -> (i32, i32) {
    %c0_i32 = arith.constant 0 : i32
    %c0_i32_0 = arith.constant 0 : i32
    return %arg0, %c0_i32 : i32, i32
  }
  func.func @transform_4(%arg0: i32) -> (i32, i32) {
    %c0_i32 = arith.constant 0 : i32
    %c0_i32_0 = arith.constant 0 : i32
    return %arg0, %c0_i32 : i32, i32
  }
}

module attributes {stable_mosaic.version = 11 : i64} {
  func.func @_matmul_stats_kernel(%arg0: i32, %arg1: memref<64x64xbf16, #tpu.memory_space<vmem>>, %arg2: memref<64x64xbf16, #tpu.memory_space<vmem>>, %arg3: memref<64x64xbf16, #tpu.memory_space<vmem>>, %arg4: memref<8x64xf32, #tpu.memory_space<vmem>>, %arg5: memref<8x64xf32, #tpu.memory_space<vmem>>) attributes {dimension_semantics = [#tpu.dimension_semantics<parallel>], iteration_bounds = array<i64: 2>, scalar_prefetch = 0 : i64, scratch_operands = 0 : i64, tpu.core_type = #tpu.core_type<tc>, window_params = [{transform_indices = @transform_0, window_bounds = array<i64: 64, 64>}, {pipeline_mode = #tpu.pipeline_mode<synchronous>, transform_indices = @transform_1, window_bounds = array<i64: 64, 64>}, {transform_indices = @transform_2, window_bounds = array<i64: 64, 64>}, {transform_indices = @transform_3, window_bounds = array<i64: 8, 64>}, {transform_indices = @transform_4, window_bounds = array<i64: 8, 64>}]} {
    %c0 = arith.constant 0 : index
    %c0_0 = arith.constant 0 : index
    %0 = vector.load %arg1[%c0, %c0_0] : memref<64x64xbf16, #tpu.memory_space<vmem>>, vector<64x64xbf16>
    %c0_1 = arith.constant 0 : index
    %c0_2 = arith.constant 0 : index
    %1 = vector.load %arg2[%c0_1, %c0_2] : memref<64x64xbf16, #tpu.memory_space<vmem>>, vector<64x64xbf16>
    %cst = arith.constant dense<0.000000e+00> : vector<64x64xf32>
    %2 = tpu.matmul %0, %1, %cst {dimension_numbers = #tpu.dot_dimension_numbers<[1], [0], [0], [1], [0, 0, 1, 1], [], []>} : vector<64x64xbf16>, vector<64x64xbf16>, vector<64x64xf32> -> vector<64x64xf32>
    %3 = arith.truncf %2 : vector<64x64xf32> to vector<64x64xbf16>
    %c0_3 = arith.constant 0 : index
    %c0_4 = arith.constant 0 : index
    %4 = vector.load %arg3[%c0_3, %c0_4] : memref<64x64xbf16, #tpu.memory_space<vmem>>, vector<64x64xbf16>
    tpu.vector_store %arg3[%c0_3, %c0_4], %3 {strides = array<i32>} : memref<64x64xbf16, #tpu.memory_space<vmem>>, vector<64x64xbf16>,
    %cst_5 = arith.constant dense<0.000000e+00> : vector<64xf32>
    %5 = vector.multi_reduction <add>, %2, %cst_5 [0] : vector<64x64xf32> to vector<64xf32>
    %6 = vector.shape_cast %5 : vector<64xf32> to vector<1x64xf32>
    %7 = vector.shape_cast %6 : vector<1x64xf32> to vector<1x64xf32>
    %8 = vector.broadcast %7 : vector<1x64xf32> to vector<8x64xf32>
    %c0_6 = arith.constant 0 : index
    %c0_7 = arith.constant 0 : index
    %9 = vector.load %arg4[%c0_6, %c0_7] : memref<8x64xf32, #tpu.memory_space<vmem>>, vector<8x64xf32>
    tpu.vector_store %arg4[%c0_6, %c0_7], %8 {strides = array<i32>} : memref<8x64xf32, #tpu.memory_space<vmem>>, vector<8x64xf32>,
    %10 = arith.mulf %2, %2 : vector<64x64xf32>
    %cst_8 = arith.constant dense<0.000000e+00> : vector<64xf32>
    %11 = vector.multi_reduction <add>, %10, %cst_8 [0] : vector<64x64xf32> to vector<64xf32>
    %12 = vector.shape_cast %11 : vector<64xf32> to vector<1x64xf32>
    %13 = vector.shape_cast %12 : vector<1x64xf32> to vector<1x64xf32>
    %14 = vector.broadcast %13 : vector<1x64xf32> to vector<8x64xf32>
    %c0_9 = arith.constant 0 : index
    %c0_10 = arith.constant 0 : index
    %15 = vector.load %arg5[%c0_9, %c0_10] : memref<8x64xf32, #tpu.memory_space<vmem>>, vector<8x64xf32>
    tpu.vector_store %arg5[%c0_9, %c0_10], %14 {strides = array<i32>} : memref<8x64xf32, #tpu.memory_space<vmem>>, vector<8x64xf32>,
    return
  }
  func.func @transform_0(%arg0: i32) -> (i32, i32) {
    %c0_i32 = arith.constant 0 : i32
    %c0_i32_0 = arith.constant 0 : i32
    return %arg0, %c0_i32 : i32, i32
  }
  func.func @transform_1(%arg0: i32) -> (i32, i32) {
    %c0_i32 = arith.constant 0 : i32
    %c0_i32_0 = arith.constant 0 : i32
    %c0_i32_1 = arith.constant 0 : i32
    return %c0_i32, %c0_i32_0 : i32, i32
  }
  func.func @transform_2(%arg0: i32) -> (i32, i32) {
    %c0_i32 = arith.constant 0 : i32
    %c0_i32_0 = arith.constant 0 : i32
    return %arg0, %c0_i32 : i32, i32
  }
  func.func @transform_3(%arg0: i32) -> (i32, i32) {
    %c0_i32 = arith.constant 0 : i32
    %c0_i32_0 = arith.constant 0 : i32
    return %arg0, %c0_i32 : i32, i32
  }
  func.func @transform_4(%arg0: i32) -> (i32, i32) {
    %c0_i32 = arith.constant 0 : i32
    %c0_i32_0 = arith.constant 0 : i32
    return %arg0, %c0_i32 : i32, i32
  }
}

module attributes {stable_mosaic.version = 11 : i64} {
  func.func @_cbam_merge_kernel(%arg0: i32, %arg1: memref<1x64x64xbf16, #tpu.memory_space<vmem>>, %arg2: memref<1x64x64xbf16, #tpu.memory_space<vmem>>, %arg3: memref<1x64x1xf32, #tpu.memory_space<vmem>>, %arg4: memref<1x1x64xf32, #tpu.memory_space<vmem>>, %arg5: memref<1x1x64xf32, #tpu.memory_space<vmem>>, %arg6: memref<1x1x64xf32, #tpu.memory_space<vmem>>, %arg7: memref<1x64x64xbf16, #tpu.memory_space<vmem>>) attributes {dimension_semantics = [#tpu.dimension_semantics<parallel>], iteration_bounds = array<i64: 2>, scalar_prefetch = 0 : i64, scratch_operands = 0 : i64, tpu.core_type = #tpu.core_type<tc>, window_params = [{transform_indices = @transform_0, window_bounds = array<i64: 1, 64, 64>}, {transform_indices = @transform_1, window_bounds = array<i64: 1, 64, 64>}, {transform_indices = @transform_2, window_bounds = array<i64: 1, 64, 1>}, {transform_indices = @transform_3, window_bounds = array<i64: 1, 1, 64>}, {pipeline_mode = #tpu.pipeline_mode<synchronous>, transform_indices = @transform_4, window_bounds = array<i64: 1, 1, 64>}, {pipeline_mode = #tpu.pipeline_mode<synchronous>, transform_indices = @transform_5, window_bounds = array<i64: 1, 1, 64>}, {transform_indices = @transform_6, window_bounds = array<i64: 1, 64, 64>}]} {
    %c0 = arith.constant 0 : index
    %c0_0 = arith.constant 0 : index
    %c0_1 = arith.constant 0 : index
    %0 = vector.load %arg1[%c0, %c0_0, %c0_1] : memref<1x64x64xbf16, #tpu.memory_space<vmem>>, vector<1x64x64xbf16>
    %1 = arith.extf %0 : vector<1x64x64xbf16> to vector<1x64x64xf32>
    %c0_2 = arith.constant 0 : index
    %c0_3 = arith.constant 0 : index
    %c0_4 = arith.constant 0 : index
    %2 = vector.load %arg5[%c0_2, %c0_3, %c0_4] : memref<1x1x64xf32, #tpu.memory_space<vmem>>, vector<1x1x64xf32>
    %3 = vector.broadcast %2 : vector<1x1x64xf32> to vector<1x64x64xf32>
    %4 = arith.mulf %1, %3 : vector<1x64x64xf32>
    %c0_5 = arith.constant 0 : index
    %c0_6 = arith.constant 0 : index
    %c0_7 = arith.constant 0 : index
    %5 = vector.load %arg6[%c0_5, %c0_6, %c0_7] : memref<1x1x64xf32, #tpu.memory_space<vmem>>, vector<1x1x64xf32>
    %6 = vector.broadcast %5 : vector<1x1x64xf32> to vector<1x64x64xf32>
    %7 = arith.addf %4, %6 : vector<1x64x64xf32>
    %c0_8 = arith.constant 0 : index
    %c0_9 = arith.constant 0 : index
    %c0_10 = arith.constant 0 : index
    %8 = vector.load %arg4[%c0_8, %c0_9, %c0_10] : memref<1x1x64xf32, #tpu.memory_space<vmem>>, vector<1x1x64xf32>
    %c0_11 = arith.constant 0 : index
    %c0_12 = arith.constant 0 : index
    %c0_13 = arith.constant 0 : index
    %9 = vector.load %arg3[%c0_11, %c0_12, %c0_13] : memref<1x64x1xf32, #tpu.memory_space<vmem>>, vector<1x64x1xf32>
    %10 = vector.broadcast %8 : vector<1x1x64xf32> to vector<1x64x64xf32>
    %11 = vector.broadcast %9 : vector<1x64x1xf32> to vector<1x64x64xf32>
    %12 = arith.mulf %10, %11 : vector<1x64x64xf32>
    %13 = arith.mulf %7, %12 : vector<1x64x64xf32>
    %c0_14 = arith.constant 0 : index
    %c0_15 = arith.constant 0 : index
    %c0_16 = arith.constant 0 : index
    %14 = vector.load %arg2[%c0_14, %c0_15, %c0_16] : memref<1x64x64xbf16, #tpu.memory_space<vmem>>, vector<1x64x64xbf16>
    %15 = arith.extf %14 : vector<1x64x64xbf16> to vector<1x64x64xf32>
    %16 = arith.addf %13, %15 : vector<1x64x64xf32>
    %cst = arith.constant 0.000000e+00 : f32
    %17 = vector.broadcast %cst : f32 to vector<1x64x64xf32>
    %18 = arith.maximumf %16, %17 : vector<1x64x64xf32>
    %19 = arith.truncf %18 : vector<1x64x64xf32> to vector<1x64x64xbf16>
    %c0_17 = arith.constant 0 : index
    %c0_18 = arith.constant 0 : index
    %c0_19 = arith.constant 0 : index
    %20 = vector.load %arg7[%c0_17, %c0_18, %c0_19] : memref<1x64x64xbf16, #tpu.memory_space<vmem>>, vector<1x64x64xbf16>
    tpu.vector_store %arg7[%c0_17, %c0_18, %c0_19], %19 {strides = array<i32>} : memref<1x64x64xbf16, #tpu.memory_space<vmem>>, vector<1x64x64xbf16>,
    return
  }
  func.func @transform_0(%arg0: i32) -> (i32, i32, i32) {
    %c0_i32 = arith.constant 0 : i32
    %c0_i32_0 = arith.constant 0 : i32
    %c0_i32_1 = arith.constant 0 : i32
    return %arg0, %c0_i32, %c0_i32_0 : i32, i32, i32
  }
  func.func @transform_1(%arg0: i32) -> (i32, i32, i32) {
    %c0_i32 = arith.constant 0 : i32
    %c0_i32_0 = arith.constant 0 : i32
    %c0_i32_1 = arith.constant 0 : i32
    return %arg0, %c0_i32, %c0_i32_0 : i32, i32, i32
  }
  func.func @transform_2(%arg0: i32) -> (i32, i32, i32) {
    %c0_i32 = arith.constant 0 : i32
    %c0_i32_0 = arith.constant 0 : i32
    %c0_i32_1 = arith.constant 0 : i32
    return %arg0, %c0_i32, %c0_i32_0 : i32, i32, i32
  }
  func.func @transform_3(%arg0: i32) -> (i32, i32, i32) {
    %c0_i32 = arith.constant 0 : i32
    %c0_i32_0 = arith.constant 0 : i32
    %c0_i32_1 = arith.constant 0 : i32
    return %arg0, %c0_i32, %c0_i32_0 : i32, i32, i32
  }
  func.func @transform_4(%arg0: i32) -> (i32, i32, i32) {
    %c0_i32 = arith.constant 0 : i32
    %c0_i32_0 = arith.constant 0 : i32
    %c0_i32_1 = arith.constant 0 : i32
    %c0_i32_2 = arith.constant 0 : i32
    return %c0_i32, %c0_i32_0, %c0_i32_1 : i32, i32, i32
  }
  func.func @transform_5(%arg0: i32) -> (i32, i32, i32) {
    %c0_i32 = arith.constant 0 : i32
    %c0_i32_0 = arith.constant 0 : i32
    %c0_i32_1 = arith.constant 0 : i32
    %c0_i32_2 = arith.constant 0 : i32
    return %c0_i32, %c0_i32_0, %c0_i32_1 : i32, i32, i32
  }
  func.func @transform_6(%arg0: i32) -> (i32, i32, i32) {
    %c0_i32 = arith.constant 0 : i32
    %c0_i32_0 = arith.constant 0 : i32
    %c0_i32_1 = arith.constant 0 : i32
    return %arg0, %c0_i32, %c0_i32_0 : i32, i32, i32
  }
}

</mosaic_0001>

<bundles_post_ra>
// kernel: resnet18_cbam_forward.9
= control target key start
LH: loop header
LB: loop body
LE: loop exit
PB: predicated region body
PF: predicated region fallthrough
CT: control target
= control target key end

     0   :  { %s1402_s15 = smov 0   ;;  %s1758_s0 = inlined_call_operand.vmem [shape: bf16[512,160], index: 0, kind: input, shape index: {}]   ;;  %s1759_s1 = inlined_call_operand.vmem [shape: bf16[160,64], index: 1, kind: input, shape index: {}]   ;;  %s1760_s2 = inlined_call_operand.vmem [shape: bf16[512,64], index: 2, kind: output, shape index: {0}]   ;;  %s1761_s3 = inlined_call_operand.vmem [shape: f32[16,64], index: 3, kind: output, shape index: {1}]   ;;  %s1762_s4 = inlined_call_operand.vmem [shape: f32[16,64], index: 4, kind: output, shape index: {2}]  }
   0x1 LB: > { %s1408_s16 = sadd.s32 4294967295, %s1374_s15   ;;  %p1148_p0 = scmp.ge.s32.totalorder %s1374_s15, 1  ;;  %s1374_s15 = sphi %s1402_s15, %s15_s15  }
   0x2   : > { %p169_p1 = scmp.lt.s32.totalorder %s1374_s15, 3 }
   0x4   : > { %p170_p2 = pnand %p1148_p0, %p169_p1 }
   0x5   : > { %v1310_v0 = vld [vmem:[%s1759_s1] sm:$0xff] (!%p170_p2)   ;;  %v1376_v1 = vmov (!%p170_p2), 0   ;;  %s1149_s19 = sshll.u32 (!%p170_p2), %s1408_s16, 5  ;;  %v1311_v2 = vld [vmem:[%s1759_s1 + $0x8] sm:$0xff] (!%p170_p2)   ;;  %v1312_v3 = vld [vmem:[%s1759_s1 + $0x10] sm:$0xff] (!%p170_p2)   ;;  %vm482_vm0 = vcmask (!%p170_p2), 261120  }
   0x6   : > { %173 = sbr.rel (%p170_p2) target bundleno = 366 (0x16e), region = 28  ;;  %531 = vmatprep.subr.bf16.mxu0 (!%p170_p2), %v1376_v1  ;;  %1281 = vmatprep.subr.bf16.mxu1 (!%p170_p2), %v1376_v1  ;;  %p205_p3 = scmp.lt.s32.totalorder (!%p170_p2), %s1149_s19, 63  ;;  %v1313_v4 = vld [vmem:[%s1759_s1 + $0x18] sm:$0xff] (!%p170_p2)   ;;  %v1314_v6 = vld [vmem:[%s1759_s1 + $0x20] sm:$0xff] (!%p170_p2)   ;;  %v1315_v8 = vld [vmem:[%s1759_s1 + $0x28] sm:$0xff] (!%p170_p2)   ;;  %vm820_vm1 = vcmask (!%p170_p2), 519168  }
   0x7   : > { %532 = vmatpush1.bf16.msra.mxu0 (!%p170_p2), %v1310_v0  ;;  %1291 = vmatpush1.bf16.msra.mxu1 (!%p170_p2), %v1310_v0  ;;  %v1316_v9 = vld [vmem:[%s1759_s1 + $0x30] sm:$0xff] (!%p170_p2)   ;;  %v1317_v10 = vld [vmem:[%s1759_s1 + $0x38] sm:$0xff] (!%p170_p2)   ;;  %v1318_v11 = vld [vmem:[%s1759_s1 + $0x40] sm:$0xff] (!%p170_p2)   ;;  %vm853_vm2 = vcmask (!%p170_p2), 523264   ;;  %p217_p4 = scmp.lt.s32.totalorder (!%p170_p2), %s1408_s16, 1 }
   0x8   : > { %533 = vmatprep.subr.bf16.mxu0 (!%p170_p2), %v1376_v1  ;;  %1282 = vmatprep.subr.bf16.mxu1 (!%p170_p2), %v1376_v1  ;;  %v1319_v12 = vld [vmem:[%s1759_s1 + $0x48] sm:$0xff] (!%p170_p2)  }
   0xb   : > { %534 = vmatpush1.bf16.msra.mxu0 (!%p170_p2), %v1311_v2  ;;  %1292 = vmatpush1.bf16.msra.mxu1 (!%p170_p2), %v1311_v2 }
   0xc   : > { %535 = vmatprep.subr.bf16.mxu0 (!%p170_p2), %v1376_v1  ;;  %1283 = vmatprep.subr.bf16.mxu1 (!%p170_p2), %v1376_v1 }
   0xd   : > { %s1764_s19 = smov (!%p205_p3, %s1149_s19), 63  ;;  %s1766_s16 = smov (!%p217_p4, %s1408_s16), 1 }
   0xe   : > { %s1248_s24 = sshll.u32 %s1764_s19, 3  ;;  %s1153_s18 = sshll.u32 %s1764_s19, 2 }
   0xf   : > { %s1428_s27 = scalar_lea.vmem %s1758_s0, %s1248_s24  ;;  %536 = vmatpush1.bf16.msra.mxu0 %v1312_v3  ;;  %1293 = vmatpush1.bf16.msra.mxu1 %v1312_v3  ;;  %s1503_s22 = scalar_lea.vmem %s1760_s2, %s1153_s18 }
  0x10   : > { %537 = vmatprep.subr.bf16.mxu0 %v1376_v1  ;;  %v1322_v5 = vld [vmem:[%s1428_s27 + $0x4] ss:$8 sps:$4 sm:$0xff]   ;;  %1284 = vmatprep.subr.bf16.mxu1 %v1376_v1  ;;  %v1320_v13 = vld [vmem:[%s1428_s27] ss:$8 sps:$4 sm:$0xff]   ;;  %v1323_v15 = vld [vmem:[%s1428_s27 + $0x14] ss:$8 sps:$4 sm:$0xff]  }
  0x11   : > { %1198 = vmatprep.mubr.msk.bf16.mxu0 %vm482_vm0, %v1322_v5  ;;  %v1334_v7 = vld [vmem:[%s1428_s27 + $0x84] ss:$8 sps:$4 sm:$0xff]   ;;  %v1332_v14 = vld [vmem:[%s1428_s27 + $0x80] ss:$8 sps:$4 sm:$0xff]   ;;  %v1338_v16 = vld [vmem:[%s1428_s27 + $0x94] ss:$8 sps:$4 sm:$0xff]  }
  0x12   : > { %1206 = vmatprep.mubr.msk.bf16.mxu1 %vm482_vm0, %v1334_v7  ;;  %v1325_v17 = vld [vmem:[%s1428_s27 + $0x10] ss:$8 sps:$4 sm:$0xff]   ;;  %v1326_v19 = vld [vmem:[%s1428_s27 + $0x24] ss:$8 sps:$4 sm:$0xff]   ;;  %v1328_v21 = vld [vmem:[%s1428_s27 + $0x20] ss:$8 sps:$4 sm:$0xff]  }
  0x13   : > { %538 = vmatpush1.bf16.msra.mxu0 %v1313_v4  ;;  %1294 = vmatpush1.bf16.msra.mxu1 %v1313_v4  ;;  %v1340_v18 = vld [vmem:[%s1428_s27 + $0x90] ss:$8 sps:$4 sm:$0xff]   ;;  %v1344_v20 = vld [vmem:[%s1428_s27 + $0xa4] ss:$8 sps:$4 sm:$0xff]   ;;  %v1346_v22 = vld [vmem:[%s1428_s27 + $0xa0] ss:$8 sps:$4 sm:$0xff]  }
  0x14   : > { %539 = vmatprep.subr.bf16.mxu0 %v1376_v1  ;;  %1285 = vmatprep.subr.bf16.mxu1 %v1376_v1  ;;  %v1329_v23 = vld [vmem:[%s1428_s27 + $0x34] ss:$8 sps:$4 sm:$0xff]   ;;  %v1331_v25 = vld [vmem:[%s1428_s27 + $0x30] ss:$8 sps:$4 sm:$0xff]   ;;  %v1335_v27 = vld [vmem:[%s1428_s27 + $0x44] ss:$8 sps:$4 sm:$0xff]  }
  0x15   : > { %v1350_v24 = vld [vmem:[%s1428_s27 + $0xb4] ss:$8 sps:$4 sm:$0xff]   ;;  %v1352_v26 = vld [vmem:[%s1428_s27 + $0xb0] ss:$8 sps:$4 sm:$0xff]   ;;  %v1356_v28 = vld [vmem:[%s1428_s27 + $0xc4] ss:$8 sps:$4 sm:$0xff]  }
  0x16   : > { %v1337_v29 = vld [vmem:[%s1428_s27 + $0x40] ss:$8 sps:$4 sm:$0xff]   ;;  %v1341_v31 = vld [vmem:[%s1428_s27 + $0x54] ss:$8 sps:$4 sm:$0xff]   ;;  %v1343_v33 = vld [vmem:[%s1428_s27 + $0x50] ss:$8 sps:$4 sm:$0xff]  }
  0x17   : > { %540 = vmatpush1.bf16.msra.mxu0 %v1314_v6  ;;  %1295 = vmatpush1.bf16.msra.mxu1 %v1314_v6  ;;  %v1358_v30 = vld [vmem:[%s1428_s27 + $0xc0] ss:$8 sps:$4 sm:$0xff]   ;;  %v1359_v32 = vld [vmem:[%s1428_s27 + $0xd4] ss:$8 sps:$4 sm:$0xff]   ;;  %v1361_v34 = vld [vmem:[%s1428_s27 + $0xd0] ss:$8 sps:$4 sm:$0xff]  }
  0x18   : > { %541 = vmatprep.subr.bf16.mxu0 %v1376_v1  ;;  %1286 = vmatprep.subr.bf16.mxu1 %v1376_v1  ;;  %v1347_v35 = vld [vmem:[%s1428_s27 + $0x64] ss:$8 sps:$4 sm:$0xff]   ;;  %v1349_v37 = vld [vmem:[%s1428_s27 + $0x60] ss:$8 sps:$4 sm:$0xff]   ;;  %v1353_v39 = vld [vmem:[%s1428_s27 + $0x74] ss:$8 sps:$4 sm:$0xff]  }
  0x19   : > { %v1362_v36 = vld [vmem:[%s1428_s27 + $0xe4] ss:$8 sps:$4 sm:$0xff]   ;;  %v1364_v38 = vld [vmem:[%s1428_s27 + $0xe0] ss:$8 sps:$4 sm:$0xff]   ;;  %v1365_v40 = vld [vmem:[%s1428_s27 + $0xf4] ss:$8 sps:$4 sm:$0xff]  }
  0x1a   : > { %v1355_v41 = vld [vmem:[%s1428_s27 + $0x70] ss:$8 sps:$4 sm:$0xff]   ;;  %s1154_s19 = sshll.u32 %s1766_s16, 3 }
  0x1b   : > { %542 = vmatpush1.bf16.msra.mxu0 %v1315_v8  ;;  %1296 = vmatpush1.bf16.msra.mxu1 %v1315_v8  ;;  %v1367_v42 = vld [vmem:[%s1428_s27 + $0xf0] ss:$8 sps:$4 sm:$0xff]   ;;  %s220_s25 = scalar_lea.vmem %s1761_s3, %s1154_s19  ;;  %s224_s28 = scalar_lea.vmem %s1762_s4, %s1154_s19 }
  0x1c   : > { %543 = vmatprep.subr.bf16.mxu0 %v1376_v1  ;;  %1287 = vmatprep.subr.bf16.mxu1 %v1376_v1 }
  0x1f   : > { %544 = vmatpush1.bf16.msra.mxu0 %v1316_v9  ;;  %1297 = vmatpush1.bf16.msra.mxu1 %v1316_v9 }
  0x20   : > { %545 = vmatprep.subr.bf16.mxu0 %v1376_v1  ;;  %1288 = vmatprep.subr.bf16.mxu1 %v1376_v1 }
  0x23   : > { %546 = vmatpush1.bf16.msra.mxu0 %v1317_v10  ;;  %1298 = vmatpush1.bf16.msra.mxu1 %v1317_v10 }
  0x24   : > { %547 = vmatprep.subr.bf16.mxu0 %v1376_v1  ;;  %1289 = vmatprep.subr.bf16.mxu1 %v1376_v1 }
  0x27   : > { %548 = vmatpush1.bf16.msra.mxu0 %v1318_v11  ;;  %1299 = vmatpush1.bf16.msra.mxu1 %v1318_v11 }
  0x28   : > { %549 = vmatprep.subr.bf16.mxu0 %v1376_v1  ;;  %1290 = vmatprep.subr.bf16.mxu1 %v1376_v1 }
  0x2b   : > { %550 = vmatpush1.bf16.msra.mxu0 %v1319_v12  ;;  %1300 = vmatpush1.bf16.msra.mxu1 %v1319_v12 }
  0x2e   : > { %564 = vmatmul.mubr.bf16.vlgmr.msra.gmra.mrb[0].mxu0 %v1320_v13  ;;  %628 = vmatmul.mubr.bf16.vlgmr.msra.gmra.mrb[0].mxu1 %v1332_v14 }
  0x2f   : > { %1199 = vmatprep.mubr.msk.bf16.mxu0 %vm482_vm0, %v1323_v15  ;;  %1207 = vmatprep.mubr.msk.bf16.mxu1 %vm482_vm0, %v1338_v16 }
  0x36   : > { %572 = vmatmul.mubr.bf16.gmra.mrb[4].mxu0 %v1325_v17  ;;  %636 = vmatmul.mubr.bf16.gmra.mrb[4].mxu1 %v1340_v18 }
  0x37   : > { %1200 = vmatprep.mubr.msk.bf16.mxu0 %vm482_vm0, %v1326_v19  ;;  %1208 = vmatprep.mubr.msk.bf16.mxu1 %vm482_vm0, %v1344_v20 }
  0x3e   : > { %580 = vmatmul.mubr.bf16.gmra.mrb[8].mxu0 %v1328_v21  ;;  %644 = vmatmul.mubr.bf16.gmra.mrb[8].mxu1 %v1346_v22 }
  0x3f   : > { %1201 = vmatprep.mubr.msk.bf16.mxu0 %vm482_vm0, %v1329_v23  ;;  %1209 = vmatprep.mubr.msk.bf16.mxu1 %vm482_vm0, %v1350_v24 }
  0x46   : > { %588 = vmatmul.mubr.bf16.gmra.mrb[12].mxu0 %v1331_v25  ;;  %652 = vmatmul.mubr.bf16.gmra.mrb[12].mxu1 %v1352_v26 }
  0x47   : > { %1202 = vmatprep.mubr.msk.bf16.mxu0 %vm482_vm0, %v1335_v27  ;;  %1210 = vmatprep.mubr.msk.bf16.mxu1 %vm482_vm0, %v1356_v28 }
  0x4e   : > { %596 = vmatmul.mubr.bf16.gmra.mrb[16].mxu0 %v1337_v29  ;;  %660 = vmatmul.mubr.bf16.gmra.mrb[16].mxu1 %v1358_v30 }
  0x4f   : > { %1203 = vmatprep.mubr.msk.bf16.mxu0 %vm482_vm0, %v1341_v31  ;;  %1211 = vmatprep.mubr.msk.bf16.mxu1 %vm482_vm0, %v1359_v32 }
  0x56   : > { %604 = vmatmul.mubr.bf16.gmra.mrb[20].mxu0 %v1343_v33  ;;  %668 = vmatmul.mubr.bf16.gmra.mrb[20].mxu1 %v1361_v34 }
  0x57   : > { %1204 = vmatprep.mubr.msk.bf16.mxu0 %vm482_vm0, %v1347_v35  ;;  %1212 = vmatprep.mubr.msk.bf16.mxu1 %vm482_vm0, %v1362_v36 }
  0x5e   : > { %612 = vmatmul.mubr.bf16.gmra.mrb[24].mxu0 %v1349_v37  ;;  %676 = vmatmul.mubr.bf16.gmra.mrb[24].mxu1 %v1364_v38 }
  0x5f   : > { %1205 = vmatprep.mubr.msk.bf16.mxu0 %vm482_vm0, %v1353_v39  ;;  %1213 = vmatprep.mubr.msk.bf16.mxu1 %vm482_vm0, %v1365_v40 }
  0x66   : > { %620 = vmatmul.mubr.bf16.gmra.mrb[28].mxu0 %v1355_v41  ;;  %684 = vmatmul.mubr.bf16.gmra.mrb[28].mxu1 %v1367_v42 }
 0x101   : > { %v565_v43 = vpop.f32.mrb[0].mxu0  ;;  %v1505_v44 = vpop.f32.mrb[0].mxu1 }
 0x102   : > { %v1249_v45 = vpack.c.bf16 %v565_v43, %v565_v43  ;;  %v924_v46 = vmul.f32 %v565_v43, %v565_v43  ;;  %v567_v47 = vpop.f32.mrb[1].mxu0  ;;  %v1265_v48 = vpack.c.bf16 %v1505_v44, %v1505_v44  ;;  %v631_v49 = vpop.f32.mrb[1].mxu1  ;;  %v854_v52 = vsel %vm853_vm2, %v565_v43, 0.0 }
 0x103   : > { %v568_v50 = vpop.f32.mrb[2].mxu0  ;;  %v1509_v51 = vpop.f32.mrb[2].mxu1 }
 0x104   : > { %821 = vst.msk [vmem:[%s1503_s22] sm:$0xf] %vm820_vm1, %v1249_v45  ;;  %v1250_v53 = vpack.c.bf16 %v568_v50, %v568_v50  ;;  %v855_v54 = vsel %vm853_vm2, %v568_v50, 0.0  ;;  %v925_v55 = vmul.f32 %v568_v50, %v568_v50  ;;  %v570_v56 = vpop.f32.mrb[3].mxu0  ;;  %837 = vst.msk [vmem:[%s1503_s22 + $0x40] sm:$0xf] %vm820_vm1, %v1265_v48  ;;  %v1266_v59 = vpack.c.bf16 %v1509_v51, %v1509_v51 }
 0x105   : > { %v634_v57 = vpop.f32.mrb[3].mxu1  ;;  %v856_v58 = vadd.f32 %v855_v54, %v854_v52  ;;  %v956_v60 = vsel %vm853_vm2, %v924_v46, 0.0 }
 0x106   : > { %822 = vst.msk [vmem:[%s1503_s22 + $0x4] sm:$0xf] %vm820_vm1, %v1250_v53  ;;  %v957_v61 = vsel %vm853_vm2, %v925_v55, 0.0  ;;  %838 = vst.msk [vmem:[%s1503_s22 + $0x44] sm:$0xf] %vm820_vm1, %v1266_v59 }
 0x107   : > { %v958_v62 = vadd.f32 %v957_v61, %v956_v60 }
 0x109   : > { %v573_v63 = vpop.f32.mrb[4].mxu0  ;;  %v1525_v0 = vpop.f32.mrb[4].mxu1 }
 0x10a   : > { %v1251_v1 = vpack.c.bf16 %v573_v63, %v573_v63  ;;  %v857_v2 = vsel %vm853_vm2, %v573_v63, 0.0  ;;  %v926_v3 = vmul.f32 %v573_v63, %v573_v63  ;;  %v575_v4 = vpop.f32.mrb[5].mxu0  ;;  %v1267_v5 = vpack.c.bf16 %v1525_v0, %v1525_v0  ;;  %v639_v6 = vpop.f32.mrb[5].mxu1 }
 0x10b   : > { %v858_v7 = vadd.f32 %v857_v2, %v856_v58  ;;  %v576_v8 = vpop.f32.mrb[6].mxu0  ;;  %v1530_v9 = vpop.f32.mrb[6].mxu1 }
 0x10c   : > { %823 = vst.msk [vmem:[%s1503_s22 + $0x8] sm:$0xf] %vm820_vm1, %v1251_v1  ;;  %v959_v10 = vsel %vm853_vm2, %v926_v3, 0.0  ;;  %v1252_v11 = vpack.c.bf16 %v576_v8, %v576_v8  ;;  %v859_v12 = vsel %vm853_vm2, %v576_v8, 0.0  ;;  %v927_v13 = vmul.f32 %v576_v8, %v576_v8  ;;  %v578_v14 = vpop.f32.mrb[7].mxu0  ;;  %v642_v15 = vpop.f32.mrb[7].mxu1 }
 0x10d   : > { %839 = vst.msk [vmem:[%s1503_s22 + $0x48] sm:$0xf] %vm820_vm1, %v1267_v5  ;;  %v960_v16 = vadd.f32 %v959_v10, %v958_v62  ;;  %v860_v17 = vadd.f32 %v859_v12, %v858_v7  ;;  %v1268_v18 = vpack.c.bf16 %v1530_v9, %v1530_v9 }
 0x10e   : > { %824 = vst.msk [vmem:[%s1503_s22 + $0xc] sm:$0xf] %vm820_vm1, %v1252_v11  ;;  %v961_v19 = vsel %vm853_vm2, %v927_v13, 0.0 }
 0x10f   : > { %v962_v20 = vadd.f32 %v961_v19, %v960_v16  ;;  %840 = vst.msk [vmem:[%s1503_s22 + $0x4c] sm:$0xf] %vm820_vm1, %v1268_v18 }
 0x111   : > { %v581_v21 = vpop.f32.mrb[8].mxu0  ;;  %v1545_v22 = vpop.f32.mrb[8].mxu1 }
 0x112   : > { %v1253_v23 = vpack.c.bf16 %v581_v21, %v581_v21  ;;  %v861_v24 = vsel %vm853_vm2, %v581_v21, 0.0  ;;  %v928_v25 = vmul.f32 %v581_v21, %v581_v21  ;;  %v583_v26 = vpop.f32.mrb[9].mxu0  ;;  %v1269_v27 = vpack.c.bf16 %v1545_v22, %v1545_v22  ;;  %v647_v28 = vpop.f32.mrb[9].mxu1 }
 0x113   : > { %v862_v29 = vadd.f32 %v861_v24, %v860_v17  ;;  %v584_v30 = vpop.f32.mrb[10].mxu0  ;;  %v1550_v31 = vpop.f32.mrb[10].mxu1 }
 0x114   : > { %825 = vst.msk [vmem:[%s1503_s22 + $0x10] sm:$0xf] %vm820_vm1, %v1253_v23  ;;  %v963_v32 = vsel %vm853_vm2, %v928_v25, 0.0  ;;  %v1254_v33 = vpack.c.bf16 %v584_v30, %v584_v30  ;;  %v863_v34 = vsel %vm853_vm2, %v584_v30, 0.0  ;;  %v929_v35 = vmul.f32 %v584_v30, %v584_v30  ;;  %v586_v36 = vpop.f32.mrb[11].mxu0  ;;  %v650_v37 = vpop.f32.mrb[11].mxu1 }
 0x115   : > { %841 = vst.msk [vmem:[%s1503_s22 + $0x50] sm:$0xf] %vm820_vm1, %v1269_v27  ;;  %v964_v38 = vadd.f32 %v963_v32, %v962_v20  ;;  %v864_v39 = vadd.f32 %v863_v34, %v862_v29  ;;  %v1270_v40 = vpack.c.bf16 %v1550_v31, %v1550_v31 }
 0x116   : > { %826 = vst.msk [vmem:[%s1503_s22 + $0x14] sm:$0xf] %vm820_vm1, %v1254_v33  ;;  %v965_v41 = vsel %vm853_vm2, %v929_v35, 0.0 }
 0x117   : > { %v966_v42 = vadd.f32 %v965_v41, %v964_v38  ;;  %842 = vst.msk [vmem:[%s1503_s22 + $0x54] sm:$0xf] %vm820_vm1, %v1270_v40 }
 0x119   : > { %v589_v43 = vpop.f32.mrb[12].mxu0  ;;  %v1565_v45 = vpop.f32.mrb[12].mxu1 }
 0x11a   : > { %v1255_v46 = vpack.c.bf16 %v589_v43, %v589_v43  ;;  %v865_v47 = vsel %vm853_vm2, %v589_v43, 0.0  ;;  %v930_v48 = vmul.f32 %v589_v43, %v589_v43  ;;  %v591_v49 = vpop.f32.mrb[13].mxu0  ;;  %v1271_v50 = vpack.c.bf16 %v1565_v45, %v1565_v45  ;;  %v655_v52 = vpop.f32.mrb[13].mxu1 }
 0x11b   : > { %v866_v53 = vadd.f32 %v865_v47, %v864_v39  ;;  %v592_v54 = vpop.f32.mrb[14].mxu0  ;;  %v1570_v55 = vpop.f32.mrb[14].mxu1 }
 0x11c   : > { %827 = vst.msk [vmem:[%s1503_s22 + $0x18] sm:$0xf] %vm820_vm1, %v1255_v46  ;;  %v967_v56 = vsel %vm853_vm2, %v930_v48, 0.0  ;;  %v1256_v57 = vpack.c.bf16 %v592_v54, %v592_v54  ;;  %v867_v58 = vsel %vm853_vm2, %v592_v54, 0.0  ;;  %v931_v59 = vmul.f32 %v592_v54, %v592_v54  ;;  %v594_v60 = vpop.f32.mrb[15].mxu0  ;;  %v658_v61 = vpop.f32.mrb[15].mxu1 }
 0x11d   : > { %843 = vst.msk [vmem:[%s1503_s22 + $0x58] sm:$0xf] %vm820_vm1, %v1271_v50  ;;  %v968_v62 = vadd.f32 %v967_v56, %v966_v42  ;;  %v868_v63 = vadd.f32 %v867_v58, %v866_v53  ;;  %v1272_v1 = vpack.c.bf16 %v1570_v55, %v1570_v55 }
 0x11e   : > { %828 = vst.msk [vmem:[%s1503_s22 + $0x1c] sm:$0xf] %vm820_vm1, %v1256_v57  ;;  %v969_v2 = vsel %vm853_vm2, %v931_v59, 0.0 }
 0x11f   : > { %v970_v3 = vadd.f32 %v969_v2, %v968_v62  ;;  %844 = vst.msk [vmem:[%s1503_s22 + $0x5c] sm:$0xf] %vm820_vm1, %v1272_v1 }
 0x121   : > { %v597_v4 = vpop.f32.mrb[16].mxu0  ;;  %v1585_v5 = vpop.f32.mrb[16].mxu1 }
 0x122   : > { %v1257_v6 = vpack.c.bf16 %v597_v4, %v597_v4  ;;  %v869_v7 = vsel %vm853_vm2, %v597_v4, 0.0  ;;  %v932_v8 = vmul.f32 %v597_v4, %v597_v4  ;;  %v599_v10 = vpop.f32.mrb[17].mxu0  ;;  %v1273_v11 = vpack.c.bf16 %v1585_v5, %v1585_v5  ;;  %v663_v12 = vpop.f32.mrb[17].mxu1 }
 0x123   : > { %v870_v13 = vadd.f32 %v869_v7, %v868_v63  ;;  %v600_v14 = vpop.f32.mrb[18].mxu0  ;;  %v1590_v15 = vpop.f32.mrb[18].mxu1 }
 0x124   : > { %829 = vst.msk [vmem:[%s1503_s22 + $0x20] sm:$0xf] %vm820_vm1, %v1257_v6  ;;  %v971_v16 = vsel %vm853_vm2, %v932_v8, 0.0  ;;  %v1258_v17 = vpack.c.bf16 %v600_v14, %v600_v14  ;;  %v871_v18 = vsel %vm853_vm2, %v600_v14, 0.0  ;;  %v933_v19 = vmul.f32 %v600_v14, %v600_v14  ;;  %v602_v20 = vpop.f32.mrb[19].mxu0  ;;  %v666_v21 = vpop.f32.mrb[19].mxu1 }
 0x125   : > { %845 = vst.msk [vmem:[%s1503_s22 + $0x60] sm:$0xf] %vm820_vm1, %v1273_v11  ;;  %v972_v23 = vadd.f32 %v971_v16, %v970_v3  ;;  %v872_v24 = vadd.f32 %v871_v18, %v870_v13  ;;  %v1274_v25 = vpack.c.bf16 %v1590_v15, %v1590_v15 }
 0x126   : > { %830 = vst.msk [vmem:[%s1503_s22 + $0x24] sm:$0xf] %vm820_vm1, %v1258_v17  ;;  %v973_v26 = vsel %vm853_vm2, %v933_v19, 0.0 }
 0x127   : > { %v974_v27 = vadd.f32 %v973_v26, %v972_v23  ;;  %846 = vst.msk [vmem:[%s1503_s22 + $0x64] sm:$0xf] %vm820_vm1, %v1274_v25  ;;  %v940_v26 = vmul.f32 %v1505_v44, %v1505_v44 }
 0x129   : > { %v605_v28 = vpop.f32.mrb[20].mxu0  ;;  %v1605_v29 = vpop.f32.mrb[20].mxu1 }
 0x12a   : > { %v1259_v30 = vpack.c.bf16 %v605_v28, %v605_v28  ;;  %v873_v32 = vsel %vm853_vm2, %v605_v28, 0.0  ;;  %v934_v33 = vmul.f32 %v605_v28, %v605_v28  ;;  %v607_v34 = vpop.f32.mrb[21].mxu0  ;;  %v1275_v35 = vpack.c.bf16 %v1605_v29, %v1605_v29  ;;  %v671_v36 = vpop.f32.mrb[21].mxu1 }
 0x12b   : > { %v874_v37 = vadd.f32 %v873_v32, %v872_v24  ;;  %v608_v38 = vpop.f32.mrb[22].mxu0  ;;  %v1610_v39 = vpop.f32.mrb[22].mxu1 }
 0x12c   : > { %831 = vst.msk [vmem:[%s1503_s22 + $0x28] sm:$0xf] %vm820_vm1, %v1259_v30  ;;  %v975_v40 = vsel %vm853_vm2, %v934_v33, 0.0  ;;  %v1260_v41 = vpack.c.bf16 %v608_v38, %v608_v38  ;;  %v875_v42 = vsel %vm853_vm2, %v608_v38, 0.0  ;;  %v935_v43 = vmul.f32 %v608_v38, %v608_v38  ;;  %v610_v46 = vpop.f32.mrb[23].mxu0  ;;  %v674_v47 = vpop.f32.mrb[23].mxu1 }
 0x12d   : > { %847 = vst.msk [vmem:[%s1503_s22 + $0x68] sm:$0xf] %vm820_vm1, %v1275_v35  ;;  %v976_v48 = vadd.f32 %v975_v40, %v974_v27  ;;  %v876_v49 = vadd.f32 %v875_v42, %v874_v37  ;;  %v1276_v50 = vpack.c.bf16 %v1610_v39, %v1610_v39  ;;  %v885_v42 = vsel %vm853_vm2, %v1505_v44, 0.0 }
 0x12e   : > { %832 = vst.msk [vmem:[%s1503_s22 + $0x2c] sm:$0xf] %vm820_vm1, %v1260_v41  ;;  %v977_v52 = vsel %vm853_vm2, %v935_v43, 0.0  ;;  %v941_v43 = vmul.f32 %v1509_v51, %v1509_v51 }
 0x12f   : > { %v978_v53 = vadd.f32 %v977_v52, %v976_v48  ;;  %848 = vst.msk [vmem:[%s1503_s22 + $0x6c] sm:$0xf] %vm820_vm1, %v1276_v50  ;;  %v887_v50 = vsel %vm853_vm2, %v1509_v51, 0.0  ;;  %v942_v52 = vmul.f32 %v1525_v0, %v1525_v0  ;;  %v891_v51 = vsel %vm853_vm2, %v1530_v9, 0.0 }
 0x131   : > { %v613_v54 = vpop.f32.mrb[24].mxu0  ;;  %v1625_v56 = vpop.f32.mrb[24].mxu1 }
 0x132   : > { %v1261_v57 = vpack.c.bf16 %v613_v54, %v613_v54  ;;  %v877_v58 = vsel %vm853_vm2, %v613_v54, 0.0  ;;  %v936_v59 = vmul.f32 %v613_v54, %v613_v54  ;;  %v615_v60 = vpop.f32.mrb[25].mxu0  ;;  %v1277_v61 = vpack.c.bf16 %v1625_v56, %v1625_v56  ;;  %v679_v62 = vpop.f32.mrb[25].mxu1 }
 0x133   : > { %v878_v63 = vadd.f32 %v877_v58, %v876_v49  ;;  %v616_v1 = vpop.f32.mrb[26].mxu0  ;;  %v1630_v2 = vpop.f32.mrb[26].mxu1  ;;  %v987_v49 = vsel %vm853_vm2, %v940_v26, 0.0  ;;  %v989_v54 = vsel %vm853_vm2, %v941_v43, 0.0  ;;  %v943_v58 = vmul.f32 %v1530_v9, %v1530_v9 }
 0x134   : > { %833 = vst.msk [vmem:[%s1503_s22 + $0x30] sm:$0xf] %vm820_vm1, %v1261_v57  ;;  %v979_v3 = vsel %vm853_vm2, %v936_v59, 0.0  ;;  %v1262_v4 = vpack.c.bf16 %v616_v1, %v616_v1  ;;  %v879_v6 = vsel %vm853_vm2, %v616_v1, 0.0  ;;  %v937_v7 = vmul.f32 %v616_v1, %v616_v1  ;;  %v618_v8 = vpop.f32.mrb[27].mxu0  ;;  %v682_v10 = vpop.f32.mrb[27].mxu1 }
 0x135   : > { %849 = vst.msk [vmem:[%s1503_s22 + $0x70] sm:$0xf] %vm820_vm1, %v1277_v61  ;;  %v980_v11 = vadd.f32 %v979_v3, %v978_v53  ;;  %v880_v12 = vadd.f32 %v879_v6, %v878_v63  ;;  %v1278_v13 = vpack.c.bf16 %v1630_v2, %v1630_v2  ;;  %v889_v57 = vsel %vm853_vm2, %v1525_v0, 0.0 }
 0x136   : > { %834 = vst.msk [vmem:[%s1503_s22 + $0x34] sm:$0xf] %vm820_vm1, %v1262_v4  ;;  %v981_v14 = vsel %vm853_vm2, %v937_v7, 0.0  ;;  %v991_v61 = vsel %vm853_vm2, %v942_v52, 0.0  ;;  %v944_v62 = vmul.f32 %v1545_v22, %v1545_v22  ;;  %v993_v3 = vsel %vm853_vm2, %v943_v58, 0.0 }
 0x137   : > { %v982_v16 = vadd.f32 %v981_v14, %v980_v11  ;;  %850 = vst.msk [vmem:[%s1503_s22 + $0x74] sm:$0xf] %vm820_vm1, %v1278_v13  ;;  %v893_v0 = vsel %vm853_vm2, %v1545_v22, 0.0  ;;  %v945_v4 = vmul.f32 %v1550_v31, %v1550_v31  ;;  %v895_v9 = vsel %vm853_vm2, %v1550_v31, 0.0 }
 0x138   : > { %v995_v8 = vsel %vm853_vm2, %v944_v62, 0.0  ;;  %v946_v10 = vmul.f32 %v1565_v45, %v1565_v45  ;;  %v897_v22 = vsel %vm853_vm2, %v1565_v45, 0.0  ;;  %v947_v14 = vmul.f32 %v1570_v55, %v1570_v55 }
 0x139   : > { %v621_v17 = vpop.f32.mrb[28].mxu0  ;;  %v1645_v18 = vpop.f32.mrb[28].mxu1  ;;  %v997_v13 = vsel %vm853_vm2, %v945_v4, 0.0  ;;  %v899_v31 = vsel %vm853_vm2, %v1570_v55, 0.0  ;;  %v901_v45 = vsel %vm853_vm2, %v1585_v5, 0.0  ;;  %v903_v55 = vsel %vm853_vm2, %v1590_v15, 0.0 }
 0x13a   : > { %v1263_v19 = vpack.c.bf16 %v621_v17, %v621_v17  ;;  %v881_v20 = vsel %vm853_vm2, %v621_v17, 0.0  ;;  %v938_v21 = vmul.f32 %v621_v17, %v621_v17  ;;  %v623_v23 = vpop.f32.mrb[29].mxu0  ;;  %v1279_v24 = vpack.c.bf16 %v1645_v18, %v1645_v18  ;;  %v687_v25 = vpop.f32.mrb[29].mxu1 }
 0x13b   : > { %v882_v27 = vadd.f32 %v881_v20, %v880_v12  ;;  %v624_v28 = vpop.f32.mrb[30].mxu0  ;;  %v1652_v30 = vpop.f32.mrb[30].mxu1  ;;  %v948_v20 = vmul.f32 %v1585_v5, %v1585_v5  ;;  %v949_v25 = vmul.f32 %v1590_v15, %v1590_v15  ;;  %v905_v5 = vsel %vm853_vm2, %v1605_v29, 0.0 }
 0x13c   : > { %835 = vst.msk [vmem:[%s1503_s22 + $0x38] sm:$0xf] %vm820_vm1, %v1263_v19  ;;  %v983_v32 = vsel %vm853_vm2, %v938_v21, 0.0  ;;  %v1264_v33 = vpack.c.bf16 %v624_v28, %v624_v28  ;;  %v883_v34 = vsel %vm853_vm2, %v624_v28, 0.0  ;;  %v939_v35 = vmul.f32 %v624_v28, %v624_v28  ;;  %v626_v36 = vpop.f32.mrb[31].mxu0  ;;  %v690_v37 = vpop.f32.mrb[31].mxu1 }
 0x13d   : > { %851 = vst.msk [vmem:[%s1503_s22 + $0x78] sm:$0xf] %vm820_vm1, %v1279_v24  ;;  %v984_v38 = vadd.f32 %v983_v32, %v982_v16  ;;  %v884_v40 = vadd.f32 %v883_v34, %v882_v27  ;;  %v1280_v41 = vpack.c.bf16 %v1652_v30, %v1652_v30  ;;  %v999_v19 = vsel %vm853_vm2, %v946_v10, 0.0 }
 0x13e   : > { %836 = vst.msk [vmem:[%s1503_s22 + $0x3c] sm:$0xf] %vm820_vm1, %v1264_v33  ;;  %v985_v46 = vsel %vm853_vm2, %v939_v35, 0.0  ;;  %v1001_v24 = vsel %vm853_vm2, %v947_v14, 0.0  ;;  %v1003_v28 = vsel %vm853_vm2, %v948_v20, 0.0  ;;  %v950_v32 = vmul.f32 %v1605_v29, %v1605_v29 }
 0x13f   : > { %v886_v47 = vadd.f32 %v885_v42, %v884_v40  ;;  %v986_v48 = vadd.f32 %v985_v46, %v984_v38  ;;  %852 = vst.msk [vmem:[%s1503_s22 + $0x7c] sm:$0xf] %vm820_vm1, %v1280_v41  ;;  %v1005_v35 = vsel %vm853_vm2, %v949_v25, 0.0  ;;  %v951_v36 = vmul.f32 %v1610_v39, %v1610_v39 }
 0x140   : > { %v1007_v40 = vsel %vm853_vm2, %v950_v32, 0.0  ;;  %v907_v15 = vsel %vm853_vm2, %v1610_v39, 0.0  ;;  %v952_v41 = vmul.f32 %v1625_v56, %v1625_v56  ;;  %v909_v29 = vsel %vm853_vm2, %v1625_v56, 0.0 }
 0x141   : > { %v888_v44 = vadd.f32 %v887_v50, %v886_v47  ;;  %v988_v53 = vadd.f32 %v987_v49, %v986_v48  ;;  %v1009_v46 = vsel %vm853_vm2, %v951_v36, 0.0  ;;  %v953_v47 = vmul.f32 %v1630_v2, %v1630_v2 }
 0x142   : > { %v954_v48 = vmul.f32 %v1645_v18, %v1645_v18  ;;  %v1011_v39 = vsel %vm853_vm2, %v952_v41, 0.0  ;;  %v911_v52 = vsel %vm853_vm2, %v1630_v2, 0.0  ;;  %v955_v58 = vmul.f32 %v1652_v30, %v1652_v30 }
 0x143   : > { %v890_v59 = vadd.f32 %v889_v57, %v888_v44  ;;  %v990_v60 = vadd.f32 %v989_v54, %v988_v53  ;;  %v913_v44 = vsel %vm853_vm2, %v1645_v18, 0.0  ;;  %v1013_v54 = vsel %vm853_vm2, %v953_v47, 0.0 }
 0x144   : > { %v1015_v57 = vsel %vm853_vm2, %v954_v48, 0.0  ;;  %v1017_v62 = vsel %vm853_vm2, %v955_v58, 0.0 }
 0x145   : > { %v892_v63 = vadd.f32 %v891_v51, %v890_v59  ;;  %v992_v1 = vadd.f32 %v991_v61, %v990_v60  ;;  %v915_v61 = vsel %vm853_vm2, %v1652_v30, 0.0 }
 0x147   : > { %v994_v6 = vadd.f32 %v993_v3, %v992_v1  ;;  %v894_v7 = vadd.f32 %v893_v0, %v892_v63 }
 0x149   : > { %v896_v11 = vadd.f32 %v895_v9, %v894_v7  ;;  %v996_v12 = vadd.f32 %v995_v8, %v994_v6 }
 0x14b   : > { %v898_v16 = vadd.f32 %v897_v22, %v896_v11  ;;  %v998_v17 = vadd.f32 %v997_v13, %v996_v12 }
 0x14d   : > { %v900_v21 = vadd.f32 %v899_v31, %v898_v16  ;;  %v1000_v23 = vadd.f32 %v999_v19, %v998_v17 }
 0x14f   : > { %v902_v26 = vadd.f32 %v901_v45, %v900_v21  ;;  %v1002_v27 = vadd.f32 %v1001_v24, %v1000_v23 }
 0x151   : > { %v1004_v33 = vadd.f32 %v1003_v28, %v1002_v27  ;;  %v904_v34 = vadd.f32 %v903_v55, %v902_v26 }
 0x153   : > { %v1006_v37 = vadd.f32 %v1005_v35, %v1004_v33  ;;  %v906_v38 = vadd.f32 %v905_v5, %v904_v34 }
 0x155   : > { %v1008_v42 = vadd.f32 %v1007_v40, %v1006_v37  ;;  %v908_v43 = vadd.f32 %v907_v15, %v906_v38 }
 0x157   : > { %v1010_v49 = vadd.f32 %v1009_v46, %v1008_v42  ;;  %v910_v50 = vadd.f32 %v909_v29, %v908_v43 }
 0x159   : > { %v1012_v53 = vadd.f32 %v1011_v39, %v1010_v49  ;;  %v912_v56 = vadd.f32 %v911_v52, %v910_v50 }
 0x15b   : > { %v1014_v59 = vadd.f32 %v1013_v54, %v1012_v53  ;;  %v914_v60 = vadd.f32 %v913_v44, %v912_v56 }
 0x15d   : > { %v1016_v51 = vadd.f32 %v1015_v57, %v1014_v59  ;;  %v916_v2 = vadd.f32 %v915_v61, %v914_v60 }
 0x15f   : > { %v917_v18 = vrot.slane %v916_v2, 4  ;;  %v1018_v63 = vadd.f32 %v1017_v62, %v1016_v51 }
 0x161   : > { %v918_v1 = vadd.f32 %v917_v18, %v916_v2  ;;  %v1019_v3 = vrot.slane %v1018_v63, 4 }
 0x163   : > { %v919_v0 = vrot.slane %v918_v1, 2  ;;  %v1020_v4 = vadd.f32 %v1019_v3, %v1018_v63 }
 0x165   : > { %v920_v6 = vadd.f32 %v919_v0, %v918_v1  ;;  %v1021_v7 = vrot.slane %v1020_v4, 2 }
 0x167   : > { %v921_v8 = vrot.slane %v920_v6, 1  ;;  %v1022_v9 = vadd.f32 %v1021_v7, %v1020_v4 }
 0x169   : > { %v922_v30 = vadd.f32 %v921_v8, %v920_v6  ;;  %v1023_v10 = vrot.slane %v1022_v9, 1 }
 0x16b   : > { %923 = vst.msk [vmem:[%s220_s25] sm:$0xff] %vm853_vm2, %v922_v30  ;;  %v1024_v11 = vadd.f32 %v1023_v10, %v1022_v9 }
 0x16d   : > { %1025 = vst.msk [vmem:[%s224_s28] sm:$0xff] %vm853_vm2, %v1024_v11 }
 0x16e PF: > { %s15_s15 = sadd.s32 1, %s1374_s15  }
 0x16f   : > { %p12_p5 = scmp.ge.s32.totalorder %s15_s15, 4  }
 0x171   :  { %14 = sbr.rel (!%p12_p5) target bundleno = 1 (0x1), region = 82 }

// kernel: resnet18_cbam_forward.10
= control target key start
LH: loop header
LB: loop body
LE: loop exit
PB: predicated region body
PF: predicated region fallthrough
CT: control target
= control target key end

     0   :  { %s1364_s15 = smov 0   ;;  %s1569_s0 = inlined_call_operand.vmem [shape: bf16[128,576], index: 0, kind: input, shape index: {}]   ;;  %s1570_s1 = inlined_call_operand.vmem [shape: bf16[576,64], index: 1, kind: input, shape index: {}]   ;;  %s1571_s2 = inlined_call_operand.vmem [shape: bf16[128,64], index: 2, kind: output, shape index: {0}]   ;;  %s1572_s3 = inlined_call_operand.vmem [shape: f32[16,64], index: 3, kind: output, shape index: {1}]   ;;  %s1573_s4 = inlined_call_operand.vmem [shape: f32[16,64], index: 4, kind: output, shape index: {2}]  }
   0x1 LB: > { %s1370_s16 = sadd.s32 4294967295, %s1337_s15   ;;  %p1061_p0 = scmp.ge.s32.totalorder %s1337_s15, 1  ;;  %s1337_s15 = sphi %s1364_s15, %s15_s15  }
   0x2   : > { %p169_p1 = scmp.lt.s32.totalorder %s1337_s15, 3 }
   0x4   : > { %p170_p2 = pnand %p1061_p0, %p169_p1 }
   0x5   : > { %v1267_v0 = vld [vmem:[%s1570_s1 + $0x40] sm:$0xff] (!%p170_p2)   ;;  %v1271_v4 = vld [vmem:[%s1570_s1 + $0x48] sm:$0xff] (!%p170_p2)   ;;  %v1275_v8 = vld [vmem:[%s1570_s1 + $0x50] sm:$0xff] (!%p170_p2)   ;;  %s1062_s23 = sshll.u32 (!%p170_p2), %s1370_s16, 3  ;;  %vm638_vm0 = vcmask (!%p170_p2), 523264   ;;  %vm878_vm1 = vcmask (!%p170_p2), 519168  }
   0x6   : > { %173 = sbr.rel (%p170_p2) target bundleno = 319 (0x13f), region = 28  ;;  %v1268_v1 = vld [vmem:[%s1570_s1 + $0xc0] sm:$0xff] (!%p170_p2)   ;;  %1146 = vmatprep.subr.bf16.mxu0 (!%p170_p2), %v1267_v0  ;;  %v1272_v5 = vld [vmem:[%s1570_s1 + $0xc8] sm:$0xff] (!%p170_p2)   ;;  %v1276_v9 = vld [vmem:[%s1570_s1 + $0xd0] sm:$0xff] (!%p170_p2)   ;;  %p205_p3 = scmp.lt.s32.totalorder (!%p170_p2), %s1062_s23, 15 }
   0x7   : > { %v1269_v2 = vld [vmem:[%s1570_s1] sm:$0xff] (!%p170_p2)   ;;  %1186 = vmatprep.subr.bf16.mxu1 (!%p170_p2), %v1268_v1  ;;  %v1273_v6 = vld [vmem:[%s1570_s1 + $0x8] sm:$0xff] (!%p170_p2)   ;;  %v1277_v10 = vld [vmem:[%s1570_s1 + $0x10] sm:$0xff] (!%p170_p2)   ;;  %p217_p4 = scmp.lt.s32.totalorder (!%p170_p2), %s1370_s16, 1 }
   0x8   : > { %v1270_v3 = vld [vmem:[%s1570_s1 + $0x80] sm:$0xff] (!%p170_p2)   ;;  %1147 = vmatpush3.bf16.msra.mxu0 (!%p170_p2), %v1269_v2  ;;  %v1274_v7 = vld [vmem:[%s1570_s1 + $0x88] sm:$0xff] (!%p170_p2)   ;;  %v1278_v11 = vld [vmem:[%s1570_s1 + $0x90] sm:$0xff] (!%p170_p2)  }
   0x9   : > { %1187 = vmatpush3.bf16.msra.mxu1 (!%p170_p2), %v1270_v3  ;;  %1148 = vmatprep.subr.bf16.mxu0 (!%p170_p2), %v1271_v4  ;;  %v1279_v12 = vld [vmem:[%s1570_s1 + $0x58] sm:$0xff] (!%p170_p2)   ;;  %v1283_v16 = vld [vmem:[%s1570_s1 + $0x60] sm:$0xff] (!%p170_p2)   ;;  %v1287_v20 = vld [vmem:[%s1570_s1 + $0x68] sm:$0xff] (!%p170_p2)  }
   0xa   : > { %1188 = vmatprep.subr.bf16.mxu1 (!%p170_p2), %v1272_v5  ;;  %v1280_v13 = vld [vmem:[%s1570_s1 + $0xd8] sm:$0xff] (!%p170_p2)   ;;  %v1284_v17 = vld [vmem:[%s1570_s1 + $0xe0] sm:$0xff] (!%p170_p2)   ;;  %v1288_v21 = vld [vmem:[%s1570_s1 + $0xe8] sm:$0xff] (!%p170_p2)  }
   0xb   : > { %v1281_v14 = vld [vmem:[%s1570_s1 + $0x18] sm:$0xff] (!%p170_p2)   ;;  %v1285_v18 = vld [vmem:[%s1570_s1 + $0x20] sm:$0xff] (!%p170_p2)   ;;  %v1289_v22 = vld [vmem:[%s1570_s1 + $0x28] sm:$0xff] (!%p170_p2)  }
   0xc   : > { %1149 = vmatpush3.bf16.msra.mxu0 (!%p170_p2), %v1273_v6  ;;  %v1282_v15 = vld [vmem:[%s1570_s1 + $0x98] sm:$0xff] (!%p170_p2)   ;;  %v1286_v19 = vld [vmem:[%s1570_s1 + $0xa0] sm:$0xff] (!%p170_p2)   ;;  %v1290_v23 = vld [vmem:[%s1570_s1 + $0xa8] sm:$0xff] (!%p170_p2)  }
   0xd   : > { %1189 = vmatpush3.bf16.msra.mxu1 %v1274_v7  ;;  %1150 = vmatprep.subr.bf16.mxu0 %v1275_v8  ;;  %s1575_s23 = smov (!%p205_p3, %s1062_s23), 15  ;;  %v1291_v24 = vld [vmem:[%s1570_s1 + $0x70] sm:$0xff]   ;;  %v1295_v28 = vld [vmem:[%s1570_s1 + $0x78] sm:$0xff]   ;;  %v1305_v36 = vld [vmem:[%s1570_s1 + $0x100] sm:$0xff]   ;;  %s1577_s16 = smov (!%p217_p4, %s1370_s16), 1 }
   0xe   : > { %1190 = vmatprep.subr.bf16.mxu1 %v1276_v9  ;;  %v1292_v25 = vld [vmem:[%s1570_s1 + $0xf0] sm:$0xff]   ;;  %s1258_s22 = smul.u32 20, %s1575_s23  ;;  %v1296_v29 = vld [vmem:[%s1570_s1 + $0xf8] sm:$0xff]   ;;  %v1312_v39 = vld [vmem:[%s1570_s1 + $0x108] sm:$0xff]   ;;  %s1065_s24 = sshll.u32 %s1575_s23, 2 }
   0xf   : > { %v1293_v26 = vld [vmem:[%s1570_s1 + $0x30] sm:$0xff]   ;;  %v1297_v30 = vld [vmem:[%s1570_s1 + $0x38] sm:$0xff]   ;;  %s1521_s27 = scalar_lea.vmem %s1571_s2, %s1065_s24  ;;  %s1066_s23 = sshll.u32 %s1577_s16, 3 }
  0x10   : > { %1151 = vmatpush3.bf16.msra.mxu0 %v1277_v10  ;;  %v1294_v27 = vld [vmem:[%s1570_s1 + $0xb0] sm:$0xff]   ;;  %s1471_s8 = scalar_lea.vmem %s1569_s0, %s1258_s22  ;;  %v1298_v31 = vld [vmem:[%s1570_s1 + $0xb8] sm:$0xff]   ;;  %s220_s30 = scalar_lea.vmem %s1572_s3, %s1066_s23 }
  0x11   : > { %1191 = vmatpush3.bf16.msra.mxu1 %v1278_v11  ;;  %1152 = vmatprep.subr.bf16.mxu0 %v1279_v12  ;;  %v1299_v32 = vld [vmem:[%s1471_s8] ss:$20 sps:$4 sm:$0xff]   ;;  %v1301_v33 = vld [vmem:[%s1471_s8 + $0x4] ss:$20 sps:$4 sm:$0xff]   ;;  %v1302_v34 = vld [vmem:[%s1471_s8 + $0x8] ss:$20 sps:$4 sm:$0xff]   ;;  %s224_s7 = scalar_lea.vmem %s1573_s4, %s1066_s23 }
  0x12   : > { %1192 = vmatprep.subr.bf16.mxu1 %v1280_v13  ;;  %v1304_v35 = vld [vmem:[%s1471_s8 + $0xc] ss:$20 sps:$4 sm:$0xff]   ;;  %683 = vmatprep.mubr.bf16.mxu0 %v1301_v33  ;;  %v1308_v38 = vld [vmem:[%s1471_s8 + $0x34] ss:$20 sps:$4 sm:$0xff]   ;;  %v1311_v41 = vld [vmem:[%s1471_s8 + $0x30] ss:$20 sps:$4 sm:$0xff]  }
  0x13   : > { %748 = vmatprep.mubr.bf16.mxu1 %v1304_v35  ;;  %v1306_v37 = vld [vmem:[%s1471_s8 + $0x2c] ss:$20 sps:$4 sm:$0xff]   ;;  %v1310_v40 = vld [vmem:[%s1471_s8 + $0x28] ss:$20 sps:$4 sm:$0xff]   ;;  %v1319_v44 = vld [vmem:[%s1570_s1 + $0x110] sm:$0xff]  }
  0x14   : > { %1153 = vmatpush3.bf16.msra.mxu0 %v1281_v14  ;;  %v1313_v42 = vld [vmem:[%s1471_s8 + $0x54] ss:$20 sps:$4 sm:$0xff]   ;;  %v1315_v43 = vld [vmem:[%s1471_s8 + $0x5c] ss:$20 sps:$4 sm:$0xff]   ;;  %v1318_v47 = vld [vmem:[%s1471_s8 + $0x58] ss:$20 sps:$4 sm:$0xff]  }
  0x15   : > { %1193 = vmatpush3.bf16.msra.mxu1 %v1282_v15  ;;  %1154 = vmatprep.subr.bf16.mxu0 %v1283_v16  ;;  %v1326_v45 = vld [vmem:[%s1570_s1 + $0x118] sm:$0xff]   ;;  %v1317_v46 = vld [vmem:[%s1471_s8 + $0x50] ss:$20 sps:$4 sm:$0xff]   ;;  %v1325_v51 = vld [vmem:[%s1471_s8 + $0x80] ss:$20 sps:$4 sm:$0xff]  }
  0x16   : > { %1194 = vmatprep.subr.bf16.mxu1 %v1284_v17  ;;  %v1320_v48 = vld [vmem:[%s1471_s8 + $0x7c] ss:$20 sps:$4 sm:$0xff]   ;;  %v1322_v49 = vld [vmem:[%s1471_s8 + $0x84] ss:$20 sps:$4 sm:$0xff]   ;;  %v1328_v53 = vld [vmem:[%s1471_s8 + $0x60] ss:$20 sps:$4 sm:$0xff]  }
  0x17   : > { %v1324_v50 = vld [vmem:[%s1471_s8 + $0x78] ss:$20 sps:$4 sm:$0xff]   ;;  %v1327_v52 = vld [vmem:[%s1471_s8 + $0x10] ss:$20 sps:$4 sm:$0xff]   ;;  %v1330_v55 = vld [vmem:[%s1471_s8 + $0x88] ss:$20 sps:$4 sm:$0xff]  }
  0x18   : > { %1155 = vmatpush3.bf16.msra.mxu0 %v1285_v18  ;;  %v1329_v54 = vld [vmem:[%s1471_s8 + $0x38] ss:$20 sps:$4 sm:$0xff]  }
  0x19   : > { %1195 = vmatpush3.bf16.msra.mxu1 %v1286_v19  ;;  %1156 = vmatprep.subr.bf16.mxu0 %v1287_v20 }
  0x1a   : > { %1196 = vmatprep.subr.bf16.mxu1 %v1288_v21 }
  0x1c   : > { %1157 = vmatpush3.bf16.msra.mxu0 %v1289_v22 }
  0x1d   : > { %1197 = vmatpush3.bf16.msra.mxu1 %v1290_v23  ;;  %1158 = vmatprep.subr.bf16.mxu0 %v1291_v24 }
  0x1e   : > { %1198 = vmatprep.subr.bf16.mxu1 %v1292_v25 }
  0x20   : > { %1159 = vmatpush3.bf16.msra.mxu0 %v1293_v26 }
  0x21   : > { %1199 = vmatpush3.bf16.msra.mxu1 %v1294_v27  ;;  %1160 = vmatprep.subr.bf16.mxu0 %v1295_v28 }
  0x22   : > { %1200 = vmatprep.subr.bf16.mxu1 %v1296_v29 }
  0x24   : > { %1161 = vmatpush3.bf16.msra.mxu0 %v1297_v30 }
  0x25   : > { %1201 = vmatpush3.bf16.msra.mxu1 %v1298_v31  ;;  %1234 = vmatprep.subr.bf16.mxu0 %v1305_v36 }
  0x26   : > { %1250 = vmatprep.subr.bf16.mxu1 %v1305_v36 }
  0x27   : > { %684 = vmatmul.mubr.bf16.vlgmr.msra.gmra.mrb[0].mxu0 %v1299_v32 }
  0x28   : > { %749 = vmatmul.mubr.bf16.vlgmr.msra.gmra.mrb[0].mxu1 %v1302_v34  ;;  %1235 = vmatpush3.bf16.msra.mxu0 %v1305_v36 }
  0x29   : > { %691 = vmatprep.mubr.bf16.mxu0 %v1306_v37  ;;  %756 = vmatprep.mubr.bf16.mxu1 %v1308_v38 }
  0x2a   : > { %1254 = vmatpush3.bf16.msra.mxu1 %v1305_v36  ;;  %1236 = vmatprep.subr.bf16.mxu0 %v1312_v39 }
  0x2b   : > { %1251 = vmatprep.subr.bf16.mxu1 %v1312_v39 }
  0x2c   : > { %1237 = vmatpush3.bf16.msra.mxu0 %v1312_v39 }
  0x2d   : > { %1238 = vmatprep.subr.bf16.mxu0 %v1319_v44 }
  0x2e   : > { %1255 = vmatpush3.bf16.msra.mxu1 %v1312_v39 }
  0x2f   : > { %692 = vmatmul.mubr.bf16.gmra.mrb[4].mxu0 %v1310_v40  ;;  %1252 = vmatprep.subr.bf16.mxu1 %v1319_v44 }
  0x30   : > { %757 = vmatmul.mubr.bf16.gmra.mrb[4].mxu1 %v1311_v41  ;;  %699 = vmatprep.mubr.bf16.mxu0 %v1313_v42 }
  0x31   : > { %764 = vmatprep.mubr.bf16.mxu1 %v1315_v43  ;;  %1239 = vmatpush3.bf16.msra.mxu0 %v1319_v44 }
  0x32   : > { %1240 = vmatprep.subr.bf16.mxu0 %v1326_v45  ;;  %1256 = vmatpush3.bf16.msra.mxu1 %v1319_v44 }
  0x33   : > { %1253 = vmatprep.subr.bf16.mxu1 %v1326_v45 }
  0x35   : > { %1241 = vmatpush3.bf16.msra.mxu0 %v1326_v45 }
  0x36   : > { %1257 = vmatpush3.bf16.msra.mxu1 %v1326_v45 }
  0x37   : > { %700 = vmatmul.mubr.bf16.gmra.mrb[8].mxu0 %v1317_v46 }
  0x38   : > { %765 = vmatmul.mubr.bf16.gmra.mrb[8].mxu1 %v1318_v47  ;;  %707 = vmatprep.mubr.bf16.mxu0 %v1320_v48 }
  0x39   : > { %772 = vmatprep.mubr.bf16.mxu1 %v1322_v49 }
  0x3f   : > { %708 = vmatmul.mubr.bf16.gmra.mrb[12].mxu0 %v1324_v50 }
  0x40   : > { %773 = vmatmul.mubr.bf16.gmra.mrb[12].mxu1 %v1325_v51  ;;  %1242 = vmatprep.mubr.msk.bf16.mxu0 %vm638_vm0, %v1327_v52 }
  0x41   : > { %1246 = vmatprep.mubr.msk.bf16.mxu1 %vm638_vm0, %v1328_v53 }
  0x47   : > { %1243 = vmatmul.mubr.msk.bf16.vlgmr.msra.gmra.mrb[16].mxu0 %vm638_vm0, %v1329_v54 }
  0x48   : > { %1247 = vmatmul.mubr.msk.bf16.vlgmr.msra.gmra.mrb[16].mxu1 %vm638_vm0, %v1330_v55 }
  0xfa   : > { %v1162_v56 = vpop.f32.mrb[0].mxu0 }
  0xfb   : > { %v1202_v57 = vpop.f32.mrb[0].mxu1  ;;  %v1163_v58 = vpop.f32.mrb[1].mxu0 }
  0xfc   : > { %v1164_v59 = vadd.f32 %v1163_v58, %v1162_v56  ;;  %v1203_v60 = vpop.f32.mrb[1].mxu1  ;;  %v1165_v61 = vpop.f32.mrb[2].mxu0 }
  0xfd   : > { %v1204_v62 = vadd.f32 %v1203_v60, %v1202_v57  ;;  %v1205_v63 = vpop.f32.mrb[2].mxu1  ;;  %v1166_v0 = vpop.f32.mrb[3].mxu0 }
  0xfe   : > { %v1167_v1 = vadd.f32 %v1166_v0, %v1165_v61  ;;  %v1206_v2 = vpop.f32.mrb[3].mxu1 }
  0xff   : > { %v1207_v3 = vadd.f32 %v1206_v2, %v1205_v63  ;;  %v751_v4 = vadd.f32 %v1204_v62, %v1164_v59 }
 0x101   : > { %v1515_v5 = vadd.f32 %v1207_v3, %v1167_v1 }
 0x102   : > { %v1168_v6 = vpop.f32.mrb[4].mxu0 }
 0x103   : > { %v1208_v7 = vpop.f32.mrb[4].mxu1  ;;  %v1169_v8 = vpop.f32.mrb[5].mxu0 }
 0x104   : > { %v1170_v9 = vadd.f32 %v1169_v8, %v1168_v6  ;;  %v1209_v10 = vpop.f32.mrb[5].mxu1  ;;  %v1171_v11 = vpop.f32.mrb[6].mxu0 }
 0x105   : > { %v1210_v12 = vadd.f32 %v1209_v10, %v1208_v7  ;;  %v1211_v13 = vpop.f32.mrb[6].mxu1  ;;  %v1172_v14 = vpop.f32.mrb[7].mxu0 }
 0x106   : > { %v1173_v15 = vadd.f32 %v1172_v14, %v1171_v11  ;;  %v1212_v16 = vpop.f32.mrb[7].mxu1 }
 0x107   : > { %v1213_v17 = vadd.f32 %v1212_v16, %v1211_v13  ;;  %v759_v18 = vadd.f32 %v1210_v12, %v1170_v9 }
 0x109   : > { %v762_v19 = vadd.f32 %v1213_v17, %v1173_v15 }
 0x10a   : > { %v1174_v20 = vpop.f32.mrb[8].mxu0 }
 0x10b   : > { %v1214_v21 = vpop.f32.mrb[8].mxu1  ;;  %v1175_v22 = vpop.f32.mrb[9].mxu0 }
 0x10c   : > { %v1176_v23 = vadd.f32 %v1175_v22, %v1174_v20  ;;  %v1215_v24 = vpop.f32.mrb[9].mxu1  ;;  %v1177_v25 = vpop.f32.mrb[10].mxu0 }
 0x10d   : > { %v1216_v26 = vadd.f32 %v1215_v24, %v1214_v21  ;;  %v1217_v27 = vpop.f32.mrb[10].mxu1  ;;  %v1178_v28 = vpop.f32.mrb[11].mxu0 }
 0x10e   : > { %v1179_v29 = vadd.f32 %v1178_v28, %v1177_v25  ;;  %v1218_v30 = vpop.f32.mrb[11].mxu1 }
 0x10f   : > { %v1219_v31 = vadd.f32 %v1218_v30, %v1217_v27  ;;  %v767_v32 = vadd.f32 %v1216_v26, %v1176_v23 }
 0x111   : > { %v770_v33 = vadd.f32 %v1219_v31, %v1179_v29 }
 0x112   : > { %v1180_v34 = vpop.f32.mrb[12].mxu0 }
 0x113   : > { %v1220_v35 = vpop.f32.mrb[12].mxu1  ;;  %v1181_v36 = vpop.f32.mrb[13].mxu0 }
 0x114   : > { %v1182_v37 = vadd.f32 %v1181_v36, %v1180_v34  ;;  %v1221_v38 = vpop.f32.mrb[13].mxu1  ;;  %v1183_v39 = vpop.f32.mrb[14].mxu0 }
 0x115   : > { %v1222_v40 = vadd.f32 %v1221_v38, %v1220_v35  ;;  %v1223_v41 = vpop.f32.mrb[14].mxu1  ;;  %v1184_v42 = vpop.f32.mrb[15].mxu0 }
 0x116   : > { %v1185_v43 = vadd.f32 %v1184_v42, %v1183_v39  ;;  %v1224_v44 = vpop.f32.mrb[15].mxu1 }
 0x117   : > { %v1225_v45 = vadd.f32 %v1224_v44, %v1223_v41  ;;  %v775_v46 = vadd.f32 %v1222_v40, %v1182_v37 }
 0x119   : > { %v778_v47 = vadd.f32 %v1225_v45, %v1185_v43 }
 0x11a   : > { %v1244_v48 = vpop.f32.mrb[16].mxu0 }
 0x11b   : > { %v824_v49 = vadd.f32 %v1244_v48, %v759_v18  ;;  %v1248_v50 = vpop.f32.mrb[16].mxu1  ;;  %v815_v51 = vpop.f32.mrb[17].mxu0 }
 0x11c   : > { %v840_v52 = vadd.f32 %v1248_v50, %v775_v46  ;;  %v816_v53 = vadd.f32 %v815_v51, %v751_v4  ;;  %v831_v54 = vpop.f32.mrb[17].mxu1  ;;  %v1245_v55 = vpop.f32.mrb[18].mxu0 }
 0x11d   : > { %v1140_v56 = vpack.c.bf16 %v824_v49, %v824_v49  ;;  %v832_v57 = vadd.f32 %v831_v54, %v767_v32  ;;  %v1249_v58 = vpop.f32.mrb[18].mxu1  ;;  %v818_v59 = vpop.f32.mrb[19].mxu0  ;;  %v827_v0 = vadd.f32 %v1245_v55, %v762_v19  ;;  %v911_v7 = vmul.f32 %v824_v49, %v824_v49 }
 0x11e   : > { %v1144_v60 = vpack.c.bf16 %v840_v52, %v840_v52  ;;  %v1138_v61 = vpack.c.bf16 %v816_v53, %v816_v53  ;;  %v834_v62 = vpop.f32.mrb[19].mxu1  ;;  %v843_v1 = vadd.f32 %v1249_v58, %v778_v47  ;;  %v819_v2 = vadd.f32 %v818_v59, %v1515_v5 }
 0x11f   : > { %881 = vst.msk [vmem:[%s1521_s27 + $0x8] sm:$0xf] %vm878_vm1, %v1140_v56  ;;  %v1142_v63 = vpack.c.bf16 %v832_v57, %v832_v57  ;;  %v835_v3 = vadd.f32 %v834_v62, %v770_v33  ;;  %v909_v4 = vmul.f32 %v816_v53, %v816_v53  ;;  %v1141_v6 = vpack.c.bf16 %v827_v0, %v827_v0 }
 0x120   : > { %885 = vst.msk [vmem:[%s1521_s27 + $0x18] sm:$0xf] %vm878_vm1, %v1144_v60  ;;  %879 = vst.msk [vmem:[%s1521_s27] sm:$0xf] %vm878_vm1, %v1138_v61  ;;  %v1145_v8 = vpack.c.bf16 %v843_v1, %v843_v1  ;;  %v1139_v9 = vpack.c.bf16 %v819_v2, %v819_v2  ;;  %v887_v10 = vsel %vm638_vm0, %v816_v53, 0.0  ;;  %v888_v11 = vsel %vm638_vm0, %v819_v2, 0.0 }
 0x121   : > { %883 = vst.msk [vmem:[%s1521_s27 + $0x10] sm:$0xf] %vm878_vm1, %v1142_v63  ;;  %882 = vst.msk [vmem:[%s1521_s27 + $0xc] sm:$0xf] %vm878_vm1, %v1141_v6  ;;  %v910_v12 = vmul.f32 %v819_v2, %v819_v2  ;;  %v1143_v13 = vpack.c.bf16 %v835_v3, %v835_v3  ;;  %v889_v5 = vadd.f32 %v888_v11, %v887_v10  ;;  %v890_v14 = vsel %vm638_vm0, %v824_v49, 0.0 }
 0x122   : > { %886 = vst.msk [vmem:[%s1521_s27 + $0x1c] sm:$0xf] %vm878_vm1, %v1145_v8  ;;  %880 = vst.msk [vmem:[%s1521_s27 + $0x4] sm:$0xf] %vm878_vm1, %v1139_v9  ;;  %v917_v15 = vsel %vm638_vm0, %v909_v4, 0.0  ;;  %v912_v16 = vmul.f32 %v827_v0, %v827_v0  ;;  %v920_v20 = vsel %vm638_vm0, %v911_v7, 0.0  ;;  %v913_v21 = vmul.f32 %v832_v57, %v832_v57 }
 0x123   : > { %v918_v17 = vsel %vm638_vm0, %v910_v12, 0.0  ;;  %884 = vst.msk [vmem:[%s1521_s27 + $0x14] sm:$0xf] %vm878_vm1, %v1143_v13  ;;  %v891_v18 = vadd.f32 %v890_v14, %v889_v5  ;;  %v892_v22 = vsel %vm638_vm0, %v827_v0, 0.0  ;;  %v894_v25 = vsel %vm638_vm0, %v832_v57, 0.0 }
 0x124   : > { %v919_v19 = vadd.f32 %v918_v17, %v917_v15  ;;  %v922_v26 = vsel %vm638_vm0, %v912_v16, 0.0  ;;  %v914_v27 = vmul.f32 %v835_v3, %v835_v3  ;;  %v915_v30 = vmul.f32 %v840_v52, %v840_v52 }
 0x125   : > { %v893_v24 = vadd.f32 %v892_v22, %v891_v18  ;;  %v924_v31 = vsel %vm638_vm0, %v913_v21, 0.0  ;;  %v896_v32 = vsel %vm638_vm0, %v835_v3, 0.0  ;;  %v898_v35 = vsel %vm638_vm0, %v840_v52, 0.0 }
 0x126   : > { %v921_v23 = vadd.f32 %v920_v20, %v919_v19  ;;  %v916_v36 = vmul.f32 %v843_v1, %v843_v1  ;;  %v926_v37 = vsel %vm638_vm0, %v914_v27, 0.0  ;;  %v928_v40 = vsel %vm638_vm0, %v915_v30, 0.0 }
 0x127   : > { %v895_v28 = vadd.f32 %v894_v25, %v893_v24  ;;  %v900_v41 = vsel %vm638_vm0, %v843_v1, 0.0 }
 0x128   : > { %v923_v29 = vadd.f32 %v922_v26, %v921_v23  ;;  %v930_v44 = vsel %vm638_vm0, %v916_v36, 0.0 }
 0x129   : > { %v897_v33 = vadd.f32 %v896_v32, %v895_v28 }
 0x12a   : > { %v925_v34 = vadd.f32 %v924_v31, %v923_v29 }
 0x12b   : > { %v899_v38 = vadd.f32 %v898_v35, %v897_v33 }
 0x12c   : > { %v927_v39 = vadd.f32 %v926_v37, %v925_v34 }
 0x12d   : > { %v901_v42 = vadd.f32 %v900_v41, %v899_v38 }
 0x12e   : > { %v929_v43 = vadd.f32 %v928_v40, %v927_v39 }
 0x12f   : > { %v902_v45 = vrot.slane %v901_v42, 4 }
 0x130   : > { %v931_v46 = vadd.f32 %v930_v44, %v929_v43 }
 0x131   : > { %v903_v47 = vadd.f32 %v902_v45, %v901_v42 }
 0x132   : > { %v932_v48 = vrot.slane %v931_v46, 4 }
 0x133   : > { %v904_v49 = vrot.slane %v903_v47, 2 }
 0x134   : > { %v933_v50 = vadd.f32 %v932_v48, %v931_v46 }
 0x135   : > { %v905_v51 = vadd.f32 %v904_v49, %v903_v47 }
 0x136   : > { %v934_v52 = vrot.slane %v933_v50, 2 }
 0x137   : > { %v906_v53 = vrot.slane %v905_v51, 1 }
 0x138   : > { %v935_v54 = vadd.f32 %v934_v52, %v933_v50 }
 0x139   : > { %v907_v55 = vadd.f32 %v906_v53, %v905_v51 }
 0x13a   : > { %v936_v56 = vrot.slane %v935_v54, 1 }
 0x13b   : > { %908 = vst.msk [vmem:[%s220_s30] sm:$0xff] %vm638_vm0, %v907_v55 }
 0x13c   : > { %v937_v57 = vadd.f32 %v936_v56, %v935_v54 }
 0x13e   : > { %938 = vst.msk [vmem:[%s224_s7] sm:$0xff] %vm638_vm0, %v937_v57 }
 0x13f PF: > { %s15_s15 = sadd.s32 1, %s1337_s15  }
 0x140   : > { %p12_p5 = scmp.ge.s32.totalorder %s15_s15, 4  }
 0x142   :  { %14 = sbr.rel (!%p12_p5) target bundleno = 1 (0x1), region = 82 }

// kernel: resnet18_cbam_forward.12
= control target key start
LH: loop header
LB: loop body
LE: loop exit
PB: predicated region body
PF: predicated region fallthrough
CT: control target
= control target key end

     0   :  { %s694_s15 = smov 0   ;;  %s774_s0 = inlined_call_operand.vmem [shape: bf16[128,64], index: 0, kind: input, shape index: {}]   ;;  %s775_s1 = inlined_call_operand.vmem [shape: bf16[64,64], index: 1, kind: input, shape index: {}]   ;;  %s776_s2 = inlined_call_operand.vmem [shape: bf16[128,64], index: 2, kind: output, shape index: {0}]   ;;  %s777_s3 = inlined_call_operand.vmem [shape: f32[16,64], index: 3, kind: output, shape index: {1}]   ;;  %s778_s4 = inlined_call_operand.vmem [shape: f32[16,64], index: 4, kind: output, shape index: {2}]  }
   0x1 LB: > { %s700_s16 = sadd.s32 4294967295, %s667_s15   ;;  %p576_p0 = scmp.ge.s32.totalorder %s667_s15, 1  ;;  %s667_s15 = sphi %s694_s15, %s15_s15  }
   0x2   : > { %p168_p1 = scmp.lt.s32.totalorder %s667_s15, 3 }
   0x4   : > { %p169_p2 = pnand %p576_p0, %p168_p1 }
   0x5   : > { %v653_v0 = vld [vmem:[%s775_s1] sm:$0xff] (!%p169_p2)   ;;  %s577_s19 = sshll.u32 (!%p169_p2), %s700_s16, 3  ;;  %v654_v1 = vld [vmem:[%s775_s1 + $0x8] sm:$0xff] (!%p169_p2)   ;;  %v655_v2 = vld [vmem:[%s775_s1 + $0x10] sm:$0xff] (!%p169_p2)   ;;  %vm283_vm0 = vcmask (!%p169_p2), 523264   ;;  %vm393_vm1 = vcmask (!%p169_p2), 519168  }
   0x6   : > { %172 = sbr.rel (%p169_p2) target bundleno = 267 (0x10b), region = 28  ;;  %p203_p3 = scmp.lt.s32.totalorder (!%p169_p2), %s577_s19, 15  ;;  %621 = vmatprep.subr.bf16.mxu0 (!%p169_p2), %v653_v0  ;;  %637 = vmatprep.subr.bf16.mxu1 (!%p169_p2), %v653_v0  ;;  %v656_v4 = vld [vmem:[%s775_s1 + $0x18] sm:$0xff] (!%p169_p2)  }
   0x7   : > { %622 = vmatpush3.bf16.msra.mxu0 (!%p169_p2), %v653_v0  ;;  %641 = vmatpush3.bf16.msra.mxu1 (!%p169_p2), %v653_v0  ;;  %p214_p4 = scmp.lt.s32.totalorder (!%p169_p2), %s700_s16, 1 }
   0x8   : > { %623 = vmatprep.subr.bf16.mxu0 (!%p169_p2), %v654_v1  ;;  %638 = vmatprep.subr.bf16.mxu1 (!%p169_p2), %v654_v1 }
   0xb   : > { %624 = vmatpush3.bf16.msra.mxu0 (!%p169_p2), %v654_v1  ;;  %642 = vmatpush3.bf16.msra.mxu1 (!%p169_p2), %v654_v1 }
   0xc   : > { %625 = vmatprep.subr.bf16.mxu0 (!%p169_p2), %v655_v2  ;;  %639 = vmatprep.subr.bf16.mxu1 (!%p169_p2), %v655_v2 }
   0xd   : > { %s780_s19 = smov (!%p203_p3, %s577_s19), 15  ;;  %s782_s16 = smov (!%p214_p4, %s700_s16), 1 }
   0xe   : > { %s578_s24 = sshll.u32 %s780_s19, 2  ;;  %s581_s7 = sshll.u32 %s782_s16, 3 }
   0xf   : > { %s206_s27 = scalar_lea.vmem %s774_s0, %s578_s24  ;;  %626 = vmatpush3.bf16.msra.mxu0 %v655_v2  ;;  %643 = vmatpush3.bf16.msra.mxu1 %v655_v2  ;;  %s727_s6 = scalar_lea.vmem %s776_s2, %s578_s24 }
  0x10   : > { %v657_v3 = vld [vmem:[%s206_s27] sm:$0xff]   ;;  %v659_v5 = vld [vmem:[%s206_s27 + $0x10] sm:$0xff]   ;;  %627 = vmatprep.subr.bf16.mxu0 %v656_v4  ;;  %640 = vmatprep.subr.bf16.mxu1 %v656_v4  ;;  %v658_v6 = vld [vmem:[%s206_s27 + $0x8] sm:$0xff]   ;;  %s217_s10 = scalar_lea.vmem %s777_s3, %s581_s7  ;;  %s221_s13 = scalar_lea.vmem %s778_s4, %s581_s7 }
  0x11   : > { %629 = vmatprep.mubr.msk.bf16.mxu0 %vm283_vm0, %v657_v3  ;;  %633 = vmatprep.mubr.msk.bf16.mxu1 %vm283_vm0, %v659_v5  ;;  %v660_v7 = vld [vmem:[%s206_s27 + $0x18] sm:$0xff]  }
  0x13   : > { %628 = vmatpush3.bf16.msra.mxu0 %v656_v4  ;;  %644 = vmatpush3.bf16.msra.mxu1 %v656_v4 }
  0x16   : > { %630 = vmatmul.mubr.msk.bf16.vlgmr.msra.gmra.mrb[0].mxu0 %vm283_vm0, %v658_v6  ;;  %634 = vmatmul.mubr.msk.bf16.vlgmr.msra.gmra.mrb[0].mxu1 %vm283_vm0, %v660_v7 }
  0xe9   : > { %v631_v8 = vpop.f32.mrb[0].mxu0  ;;  %v635_v9 = vpop.f32.mrb[0].mxu1 }
  0xea   : > { %v607_v10 = vpack.c.bf16 %v631_v8, %v631_v8  ;;  %v330_v11 = vpop.f32.mrb[1].mxu0  ;;  %v611_v12 = vpack.c.bf16 %v635_v9, %v635_v9  ;;  %v346_v13 = vpop.f32.mrb[1].mxu1  ;;  %v426_v18 = vmul.f32 %v631_v8, %v631_v8  ;;  %v405_v26 = vsel %vm283_vm0, %v631_v8, 0.0 }
  0xeb   : > { %v605_v14 = vpack.c.bf16 %v330_v11, %v330_v11  ;;  %v424_v15 = vmul.f32 %v330_v11, %v330_v11  ;;  %v632_v16 = vpop.f32.mrb[2].mxu0  ;;  %v636_v17 = vpop.f32.mrb[2].mxu1  ;;  %v402_v22 = vsel %vm283_vm0, %v330_v11, 0.0  ;;  %v609_v29 = vpack.c.bf16 %v346_v13, %v346_v13 }
  0xec   : > { %396 = vst.msk [vmem:[%s727_s6 + $0x8] sm:$0xf] %vm393_vm1, %v607_v10  ;;  %v608_v19 = vpack.c.bf16 %v632_v16, %v632_v16  ;;  %v333_v20 = vpop.f32.mrb[3].mxu0  ;;  %400 = vst.msk [vmem:[%s727_s6 + $0x18] sm:$0xf] %vm393_vm1, %v611_v12  ;;  %v349_v21 = vpop.f32.mrb[3].mxu1  ;;  %v427_v27 = vmul.f32 %v632_v16, %v632_v16  ;;  %v428_v32 = vmul.f32 %v346_v13, %v346_v13 }
  0xed   : > { %394 = vst.msk [vmem:[%s727_s6] sm:$0xf] %vm393_vm1, %v605_v14  ;;  %v606_v23 = vpack.c.bf16 %v333_v20, %v333_v20  ;;  %v403_v24 = vsel %vm283_vm0, %v333_v20, 0.0  ;;  %v425_v25 = vmul.f32 %v333_v20, %v333_v20  ;;  %v432_v30 = vsel %vm283_vm0, %v424_v15, 0.0  ;;  %398 = vst.msk [vmem:[%s727_s6 + $0x10] sm:$0xf] %vm393_vm1, %v609_v29 }
  0xee   : > { %397 = vst.msk [vmem:[%s727_s6 + $0xc] sm:$0xf] %vm393_vm1, %v608_v19  ;;  %v404_v28 = vadd.f32 %v403_v24, %v402_v22  ;;  %v612_v33 = vpack.c.bf16 %v636_v17, %v636_v17  ;;  %v435_v36 = vsel %vm283_vm0, %v426_v18, 0.0  ;;  %v407_v37 = vsel %vm283_vm0, %v632_v16, 0.0 }
  0xef   : > { %395 = vst.msk [vmem:[%s727_s6 + $0x4] sm:$0xf] %vm393_vm1, %v606_v23  ;;  %v433_v31 = vsel %vm283_vm0, %v425_v25, 0.0  ;;  %v409_v38 = vsel %vm283_vm0, %v346_v13, 0.0  ;;  %v610_v39 = vpack.c.bf16 %v349_v21, %v349_v21  ;;  %v437_v42 = vsel %vm283_vm0, %v427_v27, 0.0 }
  0xf0   : > { %v406_v34 = vadd.f32 %v405_v26, %v404_v28  ;;  %v434_v35 = vadd.f32 %v433_v31, %v432_v30  ;;  %401 = vst.msk [vmem:[%s727_s6 + $0x1c] sm:$0xf] %vm393_vm1, %v612_v33  ;;  %v439_v43 = vsel %vm283_vm0, %v428_v32, 0.0  ;;  %v429_v44 = vmul.f32 %v349_v21, %v349_v21 }
  0xf1   : > { %399 = vst.msk [vmem:[%s727_s6 + $0x14] sm:$0xf] %vm393_vm1, %v610_v39  ;;  %v430_v47 = vmul.f32 %v635_v9, %v635_v9  ;;  %v411_v48 = vsel %vm283_vm0, %v349_v21, 0.0  ;;  %v413_v51 = vsel %vm283_vm0, %v635_v9, 0.0  ;;  %v431_v52 = vmul.f32 %v636_v17, %v636_v17 }
  0xf2   : > { %v436_v40 = vadd.f32 %v435_v36, %v434_v35  ;;  %v408_v41 = vadd.f32 %v407_v37, %v406_v34  ;;  %v441_v53 = vsel %vm283_vm0, %v429_v44, 0.0  ;;  %v415_v57 = vsel %vm283_vm0, %v636_v17, 0.0 }
  0xf3   : > { %v443_v56 = vsel %vm283_vm0, %v430_v47, 0.0  ;;  %v445_v60 = vsel %vm283_vm0, %v431_v52, 0.0 }
  0xf4   : > { %v410_v45 = vadd.f32 %v409_v38, %v408_v41  ;;  %v438_v46 = vadd.f32 %v437_v42, %v436_v40 }
  0xf6   : > { %v440_v49 = vadd.f32 %v439_v43, %v438_v46  ;;  %v412_v50 = vadd.f32 %v411_v48, %v410_v45 }
  0xf8   : > { %v414_v54 = vadd.f32 %v413_v51, %v412_v50  ;;  %v442_v55 = vadd.f32 %v441_v53, %v440_v49 }
  0xfa   : > { %v416_v58 = vadd.f32 %v415_v57, %v414_v54  ;;  %v444_v59 = vadd.f32 %v443_v56, %v442_v55 }
  0xfc   : > { %v417_v61 = vrot.slane %v416_v58, 4  ;;  %v446_v62 = vadd.f32 %v445_v60, %v444_v59 }
  0xfe   : > { %v418_v63 = vadd.f32 %v417_v61, %v416_v58  ;;  %v447_v0 = vrot.slane %v446_v62, 4 }
 0x100   : > { %v419_v1 = vrot.slane %v418_v63, 2  ;;  %v448_v2 = vadd.f32 %v447_v0, %v446_v62 }
 0x102   : > { %v420_v3 = vadd.f32 %v419_v1, %v418_v63  ;;  %v449_v4 = vrot.slane %v448_v2, 2 }
 0x104   : > { %v421_v5 = vrot.slane %v420_v3, 1  ;;  %v450_v6 = vadd.f32 %v449_v4, %v448_v2 }
 0x106   : > { %v422_v7 = vadd.f32 %v421_v5, %v420_v3  ;;  %v451_v8 = vrot.slane %v450_v6, 1 }
 0x108   : > { %423 = vst.msk [vmem:[%s217_s10] sm:$0xff] %vm283_vm0, %v422_v7  ;;  %v452_v9 = vadd.f32 %v451_v8, %v450_v6 }
 0x10a   : > { %453 = vst.msk [vmem:[%s221_s13] sm:$0xff] %vm283_vm0, %v452_v9 }
 0x10b PF: > { %s15_s15 = sadd.s32 1, %s667_s15  }
 0x10c   : > { %p12_p5 = scmp.ge.s32.totalorder %s15_s15, 4  }
 0x10e   :  { %14 = sbr.rel (!%p12_p5) target bundleno = 1 (0x1), region = 82 }

// kernel: resnet18_cbam_forward.13
= control target key start
LH: loop header
LB: loop body
LE: loop exit
PB: predicated region body
PF: predicated region fallthrough
CT: control target
= control target key end

     0   :  { %s715_s21 = smov 0   ;;  %s791_s0 = inlined_call_operand.vmem [shape: bf16[2,64,64], index: 0, kind: input, shape index: {}]   ;;  %s792_s1 = inlined_call_operand.vmem [shape: bf16[2,64,64], index: 1, kind: input, shape index: {}]   ;;  %s793_s2 = inlined_call_operand.vmem [shape: f32[2,64,1], index: 2, kind: input, shape index: {}]   ;;  %s794_s3 = inlined_call_operand.vmem [shape: f32[2,1,64], index: 3, kind: input, shape index: {}]   ;;  %s795_s4 = inlined_call_operand.vmem [shape: f32[1,1,64], index: 4, kind: input, shape index: {}]   ;;  %s796_s5 = inlined_call_operand.vmem [shape: f32[1,1,64], index: 5, kind: input, shape index: {}]   ;;  %s797_s6 = inlined_call_operand.vmem [shape: bf16[2,64,64], index: 6, kind: output, shape index: {}]  }
   0x1 LB: > { %s584_s22 = sadd.s32 4294967295, %s677_s21   ;;  %p588_p0 = scmp.ge.s32.totalorder %s677_s21, 1  ;;  %s677_s21 = sphi %s715_s21, %s16_s21  }
   0x2   : > { %p240_p1 = scmp.lt.s32.totalorder %s677_s21, 3 }
   0x4   : > { %p241_p2 = pnand %p588_p0, %p240_p1 }
   0x5   : > { %p283_p3 = scmp.lt.s32.totalorder (!%p241_p2), %s584_s22, 1  ;;  %v679_v0 = vmov (!%p241_p2), 0   ;;  %v597_v13 = vld [vmem:[%s795_s4] ss:$0 sm:$0xff] (!%p241_p2)  ;;  %vm487_vm0 = vcmask (!%p241_p2), 519168  }
   0x6   : > { %244 = sbr.rel (%p241_p2) target bundleno = 168 (0xa8), region = 44  ;;  %670 = vset.pattern.permute.xlu1 (!%p241_p2), %v679_v0  ;;  %669 = vset.pattern.permute.xlu0 (!%p241_p2), %v679_v0  ;;  %v598_v18 = vld [vmem:[%s796_s5] ss:$0 sm:$0xff] (!%p241_p2) }
   0xd   : > { %s799_s22 = smov (!%p283_p3, %s584_s22), 1 }
   0xe   : > { %s612_s23 = sshll.u32 %s799_s22, 6  ;;  %s730_s27 = sshll.u32 %s799_s22, 5 }
   0xf   : > { %s297_s26 = scalar_lea.vmem %s793_s2, %s612_s23  ;;  %s287_s30 = scalar_lea.vmem %s791_s0, %s730_s27 }
  0x10   : > { %v355_v1 = vld [vmem:[%s297_s26 + $0x10] sm:$0xff]  ;;  %v353_v2 = vld [vmem:[%s297_s26] sm:$0xff]  ;;  %v356_v3 = vld [vmem:[%s297_s26 + $0x18] sm:$0xff]  ;;  %s300_s11 = scalar_lea.vmem %s794_s3, %s799_s22  ;;  %s747_s14 = scalar_lea.vmem %s792_s1, %s730_s27 }
  0x11   : > { %379 = vperm.xlu1 %670, %v355_v1   ;;  %369 = vperm.xlu0 %669, %v353_v2   ;;  %v354_v4 = vld [vmem:[%s297_s26 + $0x8] sm:$0xff]  ;;  %v357_v6 = vld [vmem:[%s297_s26 + $0x20] sm:$0xff]  ;;  %v360_v7 = vld [vmem:[%s297_s26 + $0x38] sm:$0xff]  ;;  %s765_s19 = scalar_lea.vmem %s797_s6, %s730_s27 }
  0x12   : > { %v358_v5 = vld [vmem:[%s297_s26 + $0x28] sm:$0xff]  ;;  %v359_v8 = vld [vmem:[%s297_s26 + $0x30] sm:$0xff]  ;;  %v623_v10 = vld [vmem:[%s287_s30] sm:$0xff]  }
  0x13   : > { %v654_v9 = vld [vmem:[%s287_s30 + $0x8] sm:$0xff]   ;;  %v624_v12 = vunpack.c.l.bf16 %v623_v10  ;;  %v625_v17 = vunpack.c.h.bf16 %v623_v10  ;;  %v655_v19 = vld [vmem:[%s287_s30 + $0x10] sm:$0xff]   ;;  %v752_v20 = vld [vmem:[%s300_s11] ss:$0 sm:$0xff] }
  0x14   : > { %v628_v11 = vunpack.c.l.bf16 %v654_v9  ;;  %v629_v16 = vunpack.c.h.bf16 %v654_v9  ;;  %v657_v21 = vld [vmem:[%s747_s14 + $0x8] sm:$0xff]   ;;  %v639_v22 = vld [vmem:[%s747_s14] sm:$0xff]   ;;  %v656_v27 = vld [vmem:[%s287_s30 + $0x18] sm:$0xff]   ;;  %v633_v30 = vunpack.c.h.bf16 %v655_v19  ;;  %v632_v31 = vunpack.c.l.bf16 %v655_v19 }
  0x15   : > { %384 = vperm.xlu1 %670, %v356_v3   ;;  %374 = vperm.xlu0 %669, %v354_v4   ;;  %v329_v15 = vmul.f32 %v624_v12, %v597_v13  ;;  %v330_v26 = vmul.f32 %v625_v17, %v597_v13  ;;  %v644_v33 = vunpack.c.l.bf16 %v657_v21  ;;  %v640_v35 = vunpack.c.l.bf16 %v639_v22  ;;  %v658_v58 = vld [vmem:[%s747_s14 + $0x10] sm:$0xff]   ;;  %v659_v3 = vld [vmem:[%s747_s14 + $0x18] sm:$0xff]  }
  0x16   : > { %v331_v14 = vmul.f32 %v628_v11, %v597_v13  ;;  %v332_v25 = vmul.f32 %v629_v16, %v597_v13  ;;  %v637_v36 = vunpack.c.h.bf16 %v656_v27  ;;  %v636_v37 = vunpack.c.l.bf16 %v656_v27 }
  0x17   : > { %v344_v24 = vadd.f32 %v598_v18, %v329_v15  ;;  %v345_v41 = vadd.f32 %v598_v18, %v330_v26  ;;  %v645_v43 = vunpack.c.h.bf16 %v657_v21  ;;  %v641_v45 = vunpack.c.h.bf16 %v639_v22 }
  0x18   : > { %v346_v23 = vadd.f32 %v598_v18, %v331_v14  ;;  %v347_v40 = vadd.f32 %v598_v18, %v332_v25  ;;  %v334_v46 = vmul.f32 %v633_v30, %v597_v13  ;;  %v333_v47 = vmul.f32 %v632_v31, %v597_v13 }
  0x19   : > { %394 = vperm.xlu1 %670, %v358_v5   ;;  %389 = vperm.xlu0 %669, %v357_v6   ;;  %v336_v52 = vmul.f32 %v637_v36, %v597_v13  ;;  %v335_v53 = vmul.f32 %v636_v37, %v597_v13  ;;  %v649_v5 = vunpack.c.h.bf16 %v658_v58  ;;  %v653_v15 = vunpack.c.h.bf16 %v659_v3 }
  0x1a   : > { %v349_v60 = vadd.f32 %v598_v18, %v334_v46  ;;  %v348_v62 = vadd.f32 %v598_v18, %v333_v47  ;;  %v652_v17 = vunpack.c.l.bf16 %v659_v3 }
  0x1b   : > { %v351_v10 = vadd.f32 %v598_v18, %v336_v52  ;;  %v350_v11 = vadd.f32 %v598_v18, %v335_v53 }
  0x1d   : > { %404 = vperm.xlu1 %670, %v360_v7   ;;  %399 = vperm.xlu0 %669, %v359_v8   ;;  %v648_v7 = vunpack.c.l.bf16 %v658_v58 }
  0x90   : > { %v380_v28 = vpop.permute.xlu1 %379  ;;  %v370_v29 = vpop.permute.xlu0 %369 }
  0x91   : > { %v409_v32 = vmul.f32 %v752_v20, %v380_v28  ;;  %v407_v34 = vmul.f32 %v752_v20, %v370_v29 }
  0x93   : > { %v417_v38 = vmul.f32 %v409_v32, %v346_v23  ;;  %v415_v39 = vmul.f32 %v407_v34, %v344_v24 }
  0x94   : > { %v385_v42 = vpop.permute.xlu1 %384  ;;  %v375_v44 = vpop.permute.xlu0 %374 }
  0x95   : > { %v441_v48 = vadd.f32 %v644_v33, %v417_v38  ;;  %v439_v49 = vadd.f32 %v640_v35, %v415_v39  ;;  %v410_v50 = vmul.f32 %v752_v20, %v385_v42  ;;  %v408_v51 = vmul.f32 %v752_v20, %v375_v44 }
  0x97   : > { %v449_v54 = vmax.f32 %v441_v48, 0.0  ;;  %v447_v55 = vmax.f32 %v439_v49, 0.0  ;;  %v418_v56 = vmul.f32 %v410_v50, %v347_v40  ;;  %v416_v57 = vmul.f32 %v408_v51, %v345_v41 }
  0x98   : > { %v395_v59 = vpop.permute.xlu1 %394  ;;  %v390_v61 = vpop.permute.xlu0 %389 }
  0x99   : > { %v616_v63 = vpack.c.bf16 %v449_v54, %v449_v54  ;;  %v614_v0 = vpack.c.bf16 %v447_v55, %v447_v55  ;;  %v442_v1 = vadd.f32 %v645_v43, %v418_v56  ;;  %v440_v2 = vadd.f32 %v641_v45, %v416_v57 }
  0x9a   : > { %v412_v4 = vmul.f32 %v752_v20, %v395_v59  ;;  %v411_v6 = vmul.f32 %v752_v20, %v390_v61 }
  0x9b   : > { %490 = vst.msk [vmem:[%s765_s19 + $0x8] sm:$0xf] %vm487_vm0, %v616_v63  ;;  %488 = vst.msk [vmem:[%s765_s19] sm:$0xf] %vm487_vm0, %v614_v0  ;;  %v450_v8 = vmax.f32 %v442_v1, 0.0  ;;  %v448_v9 = vmax.f32 %v440_v2, 0.0 }
  0x9c   : > { %v420_v12 = vmul.f32 %v412_v4, %v349_v60  ;;  %v419_v13 = vmul.f32 %v411_v6, %v348_v62  ;;  %v405_v14 = vpop.permute.xlu1 %404  ;;  %v400_v16 = vpop.permute.xlu0 %399 }
  0x9d   : > { %v617_v19 = vpack.c.bf16 %v450_v8, %v450_v8  ;;  %v615_v21 = vpack.c.bf16 %v448_v9, %v448_v9  ;;  %v414_v22 = vmul.f32 %v752_v20, %v405_v14  ;;  %v413_v23 = vmul.f32 %v752_v20, %v400_v16 }
  0x9e   : > { %v444_v24 = vadd.f32 %v649_v5, %v420_v12  ;;  %v443_v25 = vadd.f32 %v648_v7, %v419_v13 }
  0x9f   : > { %491 = vst.msk [vmem:[%s765_s19 + $0xc] sm:$0xf] %vm487_vm0, %v617_v19  ;;  %489 = vst.msk [vmem:[%s765_s19 + $0x4] sm:$0xf] %vm487_vm0, %v615_v21  ;;  %v422_v18 = vmul.f32 %v414_v22, %v351_v10  ;;  %v421_v26 = vmul.f32 %v413_v23, %v350_v11 }
  0xa0   : > { %v452_v27 = vmax.f32 %v444_v24, 0.0  ;;  %v451_v28 = vmax.f32 %v443_v25, 0.0 }
  0xa1   : > { %v446_v29 = vadd.f32 %v653_v15, %v422_v18  ;;  %v445_v30 = vadd.f32 %v652_v17, %v421_v26 }
  0xa2   : > { %v619_v31 = vpack.c.bf16 %v452_v27, %v452_v27  ;;  %v618_v32 = vpack.c.bf16 %v451_v28, %v451_v28 }
  0xa3   : > { %v454_v33 = vmax.f32 %v446_v29, 0.0  ;;  %v453_v34 = vmax.f32 %v445_v30, 0.0 }
  0xa4   : > { %493 = vst.msk [vmem:[%s765_s19 + $0x14] sm:$0xf] %vm487_vm0, %v619_v31  ;;  %492 = vst.msk [vmem:[%s765_s19 + $0x10] sm:$0xf] %vm487_vm0, %v618_v32 }
  0xa5   : > { %v621_v20 = vpack.c.bf16 %v454_v33, %v454_v33  ;;  %v620_v35 = vpack.c.bf16 %v453_v34, %v453_v34 }
  0xa7   : > { %495 = vst.msk [vmem:[%s765_s19 + $0x1c] sm:$0xf] %vm487_vm0, %v621_v20  ;;  %494 = vst.msk [vmem:[%s765_s19 + $0x18] sm:$0xf] %vm487_vm0, %v620_v35 }
  0xa8 PF: > { %s16_s21 = sadd.s32 1, %s677_s21  }
  0xa9   : > { %p13_p4 = scmp.ge.s32.totalorder %s16_s21, 4  }
  0xab   :  { %15 = sbr.rel (!%p13_p4) target bundleno = 1 (0x1), region = 83 }

// kernel: mul.319
= control target key start
LH: loop header
LB: loop body
LE: loop exit
PB: predicated region body
PF: predicated region fallthrough
CT: control target
= control target key end

     0   :  { %s70_s0 = inlined_call_operand.vmem [shape: f32[2,128], index: 0, kind: input, shape index: {}]   ;;  %s71_s1 = inlined_call_operand.vmem [shape: f32[2,4,4,128], index: 1, kind: output, shape index: {}]  }
   0x1   :  { %v4_v0 = vld [vmem:[%s70_s0] ss:$0 sm:$0xff]  ;;  %v22_v1 = vld [vmem:[%s70_s0 + $0x1] ss:$0 sm:$0xff] }
   0x2   :  { %5 = vst [vmem:[%s71_s1] sm:$0xf] %v4_v0  ;;  %23 = vst [vmem:[%s71_s1 + $0x10] sm:$0xf] %v22_v1 }
   0x3   :  { %24 = vst [vmem:[%s71_s1 + $0x4] sm:$0xf] %v4_v0  ;;  %25 = vst [vmem:[%s71_s1 + $0x14] sm:$0xf] %v22_v1 }
   0x4   :  { %26 = vst [vmem:[%s71_s1 + $0x8] sm:$0xf] %v4_v0  ;;  %27 = vst [vmem:[%s71_s1 + $0x18] sm:$0xf] %v22_v1 }
   0x5   :  { %28 = vst [vmem:[%s71_s1 + $0xc] sm:$0xf] %v4_v0  ;;  %29 = vst [vmem:[%s71_s1 + $0x1c] sm:$0xf] %v22_v1 }

// kernel: reverse
= control target key start
LH: loop header
LB: loop body
LE: loop exit
PB: predicated region body
PF: predicated region fallthrough
CT: control target
= control target key end

     0   :  { %v2_v0 = vlaneseq  ;;  %s264_s0 = inlined_call_operand.vmem [shape: f32[1,2,7,7], index: 0, kind: input, shape index: {}]   ;;  %s265_s1 = inlined_call_operand.vmem [shape: bf16[1,2,7,7], index: 1, kind: output, shape index: {}]  }
   0x2   :  { %v3_v1 = vsub.s32 6, %v2_v0 }
   0x4   :  { %4 = vset.pattern.permute.xlu0 %v3_v1 }
   0x5   :  { %240 = vset.pattern.permute.xlu1 %v3_v1  ;;  %v32_v2 = vld [vmem:[%s264_s0 + $0xc] sm:$0x3]  ;;  %v28_v3 = vld [vmem:[%s264_s0 + $0x4] sm:$0xff]   ;;  %v22_v4 = vld [vmem:[%s264_s0] sm:$0xf]   ;;  %v241_v27 = vmov 0.0  }
   0x6   :  { %33 = vst [vmem:[#allocation1 + $0xc] sm:$0x3] %v32_v2  ;;  %29 = vst [vmem:[#allocation1 + $0x4] sm:$0xff] %v28_v3  }
   0x7   :  { %23 = vst [vmem:[#allocation1] sm:$0xf] %v22_v4  }
   0xd   :  { %v72_v5 = vld [vmem:[#allocation1 + $0xc] sm:$0x3]  ;;  %v82_v6 = vld [vmem:[#allocation1 + $0x8] sm:$0x3]  ;;  %v77_v7 = vld [vmem:[#allocation1 + $0xa] sm:$0x3] }
   0xe   :  { %74 = vst [vmem:[#allocation0 + $0x30] sm:$0x3] %v72_v5  ;;  %84 = vst [vmem:[#allocation0 + $0x20] sm:$0x3] %v82_v6  ;;  %v87_v8 = vld [vmem:[#allocation1 + $0x6] sm:$0x3] }
   0xf   :  { %79 = vst [vmem:[#allocation0 + $0x28] sm:$0x3] %v77_v7  ;;  %v92_v9 = vld [vmem:[#allocation1 + $0x4] sm:$0x3]  ;;  %v96_v10 = vld [vmem:[#allocation1 + $0x2] sm:$0x3] }
  0x10   :  { %89 = vst [vmem:[#allocation0 + $0x18] sm:$0x3] %v87_v8  ;;  %94 = vst [vmem:[#allocation0 + $0x10] sm:$0x3] %v92_v9  ;;  %v99_v11 = vld [vmem:[#allocation1] sm:$0x3] }
  0x11   :  { %98 = vst [vmem:[#allocation0 + $0x8] sm:$0x3] %v96_v10  ;;  %100 = vst [vmem:[#allocation0] sm:$0x3] %v99_v11 }
  0x15   :  { %v102_v12 = vld [vmem:[#allocation0 + $0x30] sm:$0xff]  ;;  %v114_v13 = vld [vmem:[#allocation0 + $0x20] sm:$0xff] }
  0x16   :  { %103 = vperm.xlu0 %4, %v102_v12   ;;  %115 = vperm.xlu1 %240, %v114_v13   ;;  %v108_v14 = vld [vmem:[#allocation0 + $0x28] sm:$0xff] }
  0x17   :  { %v120_v15 = vld [vmem:[#allocation0 + $0x18] sm:$0xff]  ;;  %v126_v16 = vld [vmem:[#allocation0 + $0x10] sm:$0xff] }
  0x18   :  { %v132_v17 = vld [vmem:[#allocation0 + $0x8] sm:$0xff]  ;;  %v137_v18 = vld [vmem:[#allocation0] sm:$0xff] }
  0x1a   :  { %109 = vperm.xlu0 %4, %v108_v14   ;;  %121 = vperm.xlu1 %240, %v120_v15  }
  0x1e   :  { %127 = vperm.xlu0 %4, %v126_v16   ;;  %133 = vperm.xlu1 %240, %v132_v17  }
  0x22   :  { %138 = vperm.xlu0 %4, %v137_v18  }
  0x95   :  { %v104_v19 = vpop.permute.xlu0 %103  ;;  %v116_v20 = vpop.permute.xlu1 %115 }
  0x96   :  { %105 = vst [vmem:[#allocation2] sm:$0xff] %v104_v19  ;;  %117 = vst [vmem:[#allocation2 + $0x10] sm:$0xff] %v116_v20 }
  0x99   :  { %v110_v21 = vpop.permute.xlu0 %109  ;;  %v122_v22 = vpop.permute.xlu1 %121 }
  0x9a   :  { %111 = vst [vmem:[#allocation2 + $0x8] sm:$0xff] %v110_v21  ;;  %123 = vst [vmem:[#allocation2 + $0x18] sm:$0xff] %v122_v22 }
  0x9d   :  { %v145_v23 = vld [vmem:[#allocation2] sm:$0x3]  ;;  %v156_v24 = vld [vmem:[#allocation2 + $0x10] sm:$0x3]  ;;  %v128_v25 = vpop.permute.xlu0 %127  ;;  %v134_v26 = vpop.permute.xlu1 %133 }
  0x9e   :  { %v146_v28 = vpack.c.bf16 %v241_v27, %v145_v23  ;;  %v157_v29 = vpack.c.bf16 %v241_v27, %v156_v24  ;;  %129 = vst [vmem:[#allocation2 + $0x20] sm:$0xff] %v128_v25  ;;  %135 = vst [vmem:[#allocation2 + $0x28] sm:$0xff] %v134_v26 }
  0xa0   :  { %148 = vst [vmem:[#allocation3] sm:$0x1] %v146_v28  ;;  %161 = vst [vmem:[#allocation3 + $0x2] sm:$0x1] %v157_v29 }
  0xa1   :  { %v150_v30 = vld [vmem:[#allocation2 + $0x8] sm:$0x3]  ;;  %v163_v31 = vld [vmem:[#allocation2 + $0x18] sm:$0x3]  ;;  %v139_v32 = vpop.permute.xlu0 %138 }
  0xa2   :  { %v151_v33 = vpack.c.bf16 %v241_v27, %v150_v30  ;;  %v164_v34 = vpack.c.bf16 %v241_v27, %v163_v31  ;;  %140 = vst [vmem:[#allocation2 + $0x30] sm:$0xff] %v139_v32 }
  0xa4   :  { %154 = vst [vmem:[#allocation3 + $0x1] sm:$0x1] %v151_v33  ;;  %168 = vst [vmem:[#allocation3 + $0x3] sm:$0x1] %v164_v34 }
  0xa5   :  { %v170_v35 = vld [vmem:[#allocation2 + $0x20] sm:$0x3]  ;;  %v177_v36 = vld [vmem:[#allocation2 + $0x28] sm:$0x3] }
  0xa6   :  { %v171_v37 = vpack.c.bf16 %v241_v27, %v170_v35  ;;  %v178_v38 = vpack.c.bf16 %v241_v27, %v177_v36 }
  0xa8   :  { %175 = vst [vmem:[#allocation3 + $0x4] sm:$0x1] %v171_v37  ;;  %182 = vst [vmem:[#allocation3 + $0x5] sm:$0x1] %v178_v38 }
  0xa9   :  { %v184_v39 = vld [vmem:[#allocation2 + $0x30] sm:$0x3] }
  0xaa   :  { %v185_v40 = vpack.c.bf16 %v241_v27, %v184_v39 }
  0xac   :  { %189 = vst [vmem:[#allocation3 + $0x6] sm:$0x1] %v185_v40 }
  0xb3   :  { %v205_v41 = vld [vmem:[#allocation3] sm:$0x7f] }
  0xb4   :  { %206 = vst [vmem:[%s265_s1] sm:$0x7f] %v205_v41 }

// kernel: mul.375.clone
= control target key start
LH: loop header
LB: loop body
LE: loop exit
PB: predicated region body
PF: predicated region fallthrough
CT: control target
= control target key end

     0   :  { %s84_s0 = inlined_call_operand.vmem [shape: f32[2,256], index: 0, kind: input, shape index: {}]   ;;  %s85_s1 = inlined_call_operand.vmem [shape: f32[2,2,2,256], index: 1, kind: output, shape index: {}]  }
   0x1   :  { %v4_v0 = vld [vmem:[%s84_s0] ss:$0 sm:$0xff]  ;;  %v28_v1 = vld [vmem:[%s84_s0 + $0x1] ss:$0 sm:$0xff]  ;;  %v32_v2 = vld [vmem:[%s84_s0 + $0x2] ss:$0 sm:$0xff] }
   0x2   :  { %5 = vst [vmem:[%s85_s1] sm:$0x3] %v4_v0  ;;  %29 = vst [vmem:[%s85_s1 + $0x8] sm:$0x3] %v28_v1  ;;  %v34_v3 = vld [vmem:[%s84_s0 + $0x3] ss:$0 sm:$0xff] }
   0x3   :  { %30 = vst [vmem:[%s85_s1 + $0x4] sm:$0x3] %v4_v0  ;;  %31 = vst [vmem:[%s85_s1 + $0xc] sm:$0x3] %v28_v1 }
   0x4   :  { %33 = vst [vmem:[%s85_s1 + $0x2] sm:$0x3] %v32_v2  ;;  %36 = vst [vmem:[%s85_s1 + $0x6] sm:$0x3] %v32_v2 }
   0x5   :  { %35 = vst [vmem:[%s85_s1 + $0xa] sm:$0x3] %v34_v3  ;;  %37 = vst [vmem:[%s85_s1 + $0xe] sm:$0x3] %v34_v3 }

</bundles_post_ra>
